<compile_context>
chip_gen: v7x
topology: tpu7x:2x2x1
jax: 0.10.0
libtpu: 0.0.40
codegen_flags: <defaults>
</compile_context>

<pallas_src>
import functools

import jax
import jax.numpy as jnp
from jax.experimental import pallas as pl
from jax.experimental.pallas import tpu as pltpu

VARIANCE_CENTER = 0.1
VARIANCE_SIZE = 0.2


# ----------------------------------------------------------------------------
# Kernel 1: fused 3x3 / stride-2 / pad-1 conv (+ bias + ReLU), one image / step
# ----------------------------------------------------------------------------
def _conv3x3s2_kernel(x_ref, w_ref, b_ref, o_ref, *, ho, wo, relu):
    """x_ref: (1, 4, Hq, Wq, Cin) phase-split padded input (phase = ph*2+pw).
    w_ref: (9, Cin, Cout) tap-major weights. b_ref: (1, 1, Cout).
    o_ref: (1, ho, wo, Cout)."""
    cin = w_ref.shape[1]
    cout = w_ref.shape[2]

    # Load the four phase planes once (input is read exactly once per image).
    planes = [x_ref[0, p] for p in range(4)]              # each (Hq, Wq, Cin)

    acc = jnp.zeros((ho, wo, cout), jnp.float32)
    for kh in range(3):
        for kw in range(3):
            plane = planes[(kh % 2) * 2 + (kw % 2)]
            r0, c0 = kh // 2, kw // 2
            tap = plane[r0:r0 + ho, c0:c0 + wo, :]         # (ho, wo, cin) unit-stride
            w_tap = jnp.broadcast_to(
                w_ref[kh * 3 + kw].astype(jnp.bfloat16), (ho, cin, cout))
            # batched MXU matmul: batch=ho, M=wo, K=cin, N=cout (f32 accumulate)
            acc = acc + jnp.einsum(
                "hwc,hcd->hwd", tap.astype(jnp.bfloat16), w_tap,
                preferred_element_type=jnp.float32)

    acc = acc + b_ref[...]
    if relu:
        acc = jnp.maximum(acc, 0.0)
    o_ref[0] = acc.astype(o_ref.dtype)


def conv3x3_s2_fused(x_nhwc, w, b, relu):
    """3x3, stride 2, pad 1 conv. w is PyTorch layout (Cout, Cin, 3, 3)."""
    B, H, W, Cin = x_nhwc.shape
    assert H % 2 == 0 and W % 2 == 0, "even spatial sizes expected"
    Cout = w.shape[0]
    Ho = (H + 2 - 3) // 2 + 1
    Wo = (W + 2 - 3) // 2 + 1
    Hq, Wq = (H + 2) // 2, (W + 2) // 2

    # Pad once and split into 2x2 spatial phases (no data duplication); this
    # makes every conv tap a unit-stride window inside the kernel.
    xp = jnp.pad(x_nhwc, ((0, 0), (1, 1), (1, 1), (0, 0)))
    xs = xp.reshape(B, Hq, 2, Wq, 2, Cin).transpose(0, 2, 4, 1, 3, 5)
    xs = xs.reshape(B, 4, Hq, Wq, Cin)

    wt = jnp.transpose(w, (2, 3, 1, 0)).reshape(9, Cin, Cout)   # tap-major
    bb = b.reshape(1, 1, Cout)

    kernel = functools.partial(_conv3x3s2_kernel, ho=Ho, wo=Wo, relu=relu)
    return pl.pallas_call(
        kernel,
        out_shape=jax.ShapeDtypeStruct((B, Ho, Wo, Cout), jnp.float32),
        grid=(B,),
        in_specs=[
            pl.BlockSpec((1, 4, Hq, Wq, Cin), lambda bi: (bi, 0, 0, 0, 0)),
            pl.BlockSpec((9, Cin, Cout), lambda bi: (0, 0, 0)),
            pl.BlockSpec((1, 1, Cout), lambda bi: (0, 0, 0)),
        ],
        out_specs=pl.BlockSpec((1, Ho, Wo, Cout), lambda bi: (bi, 0, 0, 0)),
        compiler_params=pltpu.CompilerParams(dimension_semantics=("parallel",)),
    )(xs, wt, bb)


# ----------------------------------------------------------------------------
# Kernel 2: fused detection head (1x1 conv) + softmax + SSD box decode
# ----------------------------------------------------------------------------
def _head_decode_kernel(f_ref, wh_ref, bh_ref, anc_ref, scores_ref, boxes_ref,
                        *, num_classes, num_anchors):
    """f_ref: (1, C2, HW) features (spatial on lanes). wh_ref: (A*(C+4), C2).
    bh_ref: (A*(C+4), 1). anc_ref: (A, 4, HW) anchors as (cx, cy, w, h) rows.
    scores_ref: (1, A, C, HW). boxes_ref: (1, A, 4, HW)."""
    C = num_classes
    feat = f_ref[0]                                              # (C2, HW)

    # 1x1 conv head as a single MXU matmul (lanes = spatial positions).
    head = jnp.dot(wh_ref[...].astype(jnp.bfloat16), feat.astype(jnp.bfloat16),
                   preferred_element_type=jnp.float32) + bh_ref[...]

    for a in range(num_anchors):
        base = a * (C + 4)

        # class softmax over the (small) sublane class axis
        logits = head[base:base + C, :]                          # (C, HW)
        m = jnp.max(logits, axis=0, keepdims=True)
        e = jnp.exp(logits - m)
        denom = jnp.sum(e, axis=0, keepdims=True)
        scores_ref[0, a] = e * pl.reciprocal(denom, approx=True)

        # box decode against anchors (cx, cy, w, h) in normalized coords
        loc = head[base + C:base + C + 4, :]                     # (4, HW)
        anc = anc_ref[a]                                         # (4, HW)
        a_cx, a_cy = anc[0:1, :], anc[1:2, :]
        a_w, a_h = anc[2:3, :], anc[3:4, :]
        cx = a_cx + loc[0:1, :] * VARIANCE_CENTER * a_w
        cy = a_cy + loc[1:2, :] * VARIANCE_CENTER * a_h
        # TODO(synk): reference SSD decodes usually clamp loc*variance before exp.
        w = a_w * jnp.exp(loc[2:3, :] * VARIANCE_SIZE)
        h = a_h * jnp.exp(loc[3:4, :] * VARIANCE_SIZE)
        boxes_ref[0, a] = jnp.concatenate(
            [cx - 0.5 * w, cy - 0.5 * h, cx + 0.5 * w, cy + 0.5 * h], axis=0)


def head_decode(f2, wh, bh, anchors_lane, num_classes, num_anchors):
    B, Hf, Wf, C2 = f2.shape
    HW = Hf * Wf
    A, C = num_anchors, num_classes
    head_ch = A * (C + 4)

    # lane-dense layout for the fused kernel: channels on sublanes, HW on lanes
    f2t = f2.reshape(B, HW, C2).transpose(0, 2, 1)               # (B, C2, HW)

    kernel = functools.partial(_head_decode_kernel,
                               num_classes=C, num_anchors=A)
    scores_k, boxes_k = pl.pallas_call(
        kernel,
        out_shape=(jax.ShapeDtypeStruct((B, A, C, HW), jnp.float32),
                   jax.ShapeDtypeStruct((B, A, 4, HW), jnp.float32)),
        grid=(B,),
        in_specs=[
            pl.BlockSpec((1, C2, HW), lambda bi: (bi, 0, 0)),
            pl.BlockSpec((head_ch, C2), lambda bi: (0, 0)),
            pl.BlockSpec((head_ch, 1), lambda bi: (0, 0)),
            pl.BlockSpec((A, 4, HW), lambda bi: (0, 0, 0)),
        ],
        out_specs=(pl.BlockSpec((1, A, C, HW), lambda bi: (bi, 0, 0, 0)),
                   pl.BlockSpec((1, A, 4, HW), lambda bi: (bi, 0, 0, 0))),
        compiler_params=pltpu.CompilerParams(dimension_semantics=("parallel",)),
    )(f2t, wh, bh, anchors_lane)

    # back to the (B, N, C) / (B, N, 4) convention with n = pos * A + a
    scores = scores_k.transpose(0, 3, 1, 2).reshape(B, HW * A, C)
    boxes = boxes_k.transpose(0, 3, 1, 2).reshape(B, HW * A, 4)
    return scores, boxes


# ----------------------------------------------------------------------------
# Detector (backbone -> head -> prior)
# ----------------------------------------------------------------------------
def make_anchors(fh, fw, scales=(0.2, 0.4)):
    """(fh*fw*A, 4) anchors ordered n = (h*fw + w)*A + a, as (cx, cy, w, h)."""
    ys = (jnp.arange(fh, dtype=jnp.float32) + 0.5) / fh
    xs = (jnp.arange(fw, dtype=jnp.float32) + 0.5) / fw
    cy, cx = jnp.meshgrid(ys, xs, indexing="ij")
    per_scale = [
        jnp.stack([cx, cy, jnp.full_like(cx, s), jnp.full_like(cy, s)], axis=-1)
        for s in scales
    ]
    return jnp.stack(per_scale, axis=2).reshape(-1, 4)


def _conv_out(h):
    return (h + 2 - 3) // 2 + 1


class DetectorPallas:
    """Concrete Detector: 2-conv backbone, 1x1 conv head, SSD-style Prior."""

    def __init__(self, key, in_ch=4, c1=8, c2=16, num_classes=3, num_anchors=2,
                 in_hw=16):
        self.num_classes = num_classes
        self.num_anchors = num_anchors
        self.c2 = c2
        self.head_ch = num_anchors * (num_classes + 4)
        k1, k2, k3 = jax.random.split(key, 3)
        self.params = {
            "w1": 0.1 * jax.random.normal(k1, (c1, in_ch, 3, 3), jnp.float32),
            "b1": jnp.zeros((c1,), jnp.float32),
            "w2": 0.1 * jax.random.normal(k2, (c2, c1, 3, 3), jnp.float32),
            "b2": jnp.zeros((c2,), jnp.float32),
            "wh": 0.1 * jax.random.normal(k3, (self.head_ch, c2, 1, 1), jnp.float32),
            "bh": jnp.zeros((self.head_ch,), jnp.float32),
        }
        # Anchors precomputed once (not per call) and pre-transposed to the
        # decode-kernel layout (A, 4, HW) with HW on the lane axis.
        self.feat_hw = _conv_out(_conv_out(in_hw))
        hw = self.feat_hw * self.feat_hw
        self.anchors = make_anchors(self.feat_hw, self.feat_hw)
        self.anchors_lane = self.anchors.reshape(hw, num_anchors, 4).transpose(1, 2, 0)

    def predict(self, x_nchw):
        p = self.params
        x = jnp.transpose(x_nchw, (0, 2, 3, 1))                  # NCHW -> NHWC
        f1 = conv3x3_s2_fused(x, p["w1"], p["b1"], relu=True)    # backbone stage 1
        # TODO(synk): full backbone fusion (keeping f1 resident in VMEM across both
        # convs) needs an in-kernel re-phase-split of the stride-2 activations.
        f2 = conv3x3_s2_fused(f1, p["w2"], p["b2"], relu=True)   # backbone stage 2
        return [f2]                                              # single-scale feats

    def __call__(self, x_nchw, targets=None):
        # TODO(synk): targets (training / loss) branch requires a concrete Prior
        # loss definition; only the inference decode path is implemented.
        feats = self.predict(x_nchw)
        f2 = feats[0]                                            # (B, Hf, Wf, C2)
        assert f2.shape[1] == self.feat_hw and f2.shape[2] == self.feat_hw
        p = self.params
        wh = p["wh"].reshape(self.head_ch, self.c2)              # 1x1 conv weight
        bh = p["bh"].reshape(self.head_ch, 1)
        return head_decode(f2, wh, bh, self.anchors_lane,
                           self.num_classes, self.num_anchors)


if __name__ == "__main__":
    key = jax.random.PRNGKey(0)
    k_x, k_p = jax.random.split(key)
    x = jax.random.normal(k_x, (2, 4, 16, 16), jnp.float32)      # NCHW like PyTorch

    detector = DetectorPallas(k_p, in_ch=4, c1=8, c2=16,
                              num_classes=3, num_anchors=2, in_hw=16)
    scores, boxes = detector(x)
    jax.block_until_ready((scores, boxes))

    assert scores.shape == (2, 32, 3) and boxes.shape == (2, 32, 4)
    assert bool(jnp.all(jnp.isfinite(scores))) and bool(jnp.all(jnp.isfinite(boxes)))
    print("KERNEL_OK")
</pallas_src>

<mosaic_0001>
module attributes {stable_mosaic.version = 11 : i64} {
  func.func @_conv3x3s2_kernel(%arg0: i32, %arg1: memref<1x4x9x9x4xf32, #tpu.memory_space<vmem>>, %arg2: memref<9x4x8xf32, #tpu.memory_space<vmem>>, %arg3: memref<1x1x8xf32, #tpu.memory_space<vmem>>, %arg4: memref<1x8x8x8xf32, #tpu.memory_space<vmem>>) attributes {dimension_semantics = [#tpu.dimension_semantics<parallel>], iteration_bounds = array<i64: 2>, scalar_prefetch = 0 : i64, scratch_operands = 0 : i64, tpu.core_type = #tpu.core_type<tc>, window_params = [{transform_indices = @transform_0, window_bounds = array<i64: 1, 4, 9, 9, 4>}, {pipeline_mode = #tpu.pipeline_mode<synchronous>, transform_indices = @transform_1, window_bounds = array<i64: 9, 4, 8>}, {pipeline_mode = #tpu.pipeline_mode<synchronous>, transform_indices = @transform_2, window_bounds = array<i64: 1, 1, 8>}, {transform_indices = @transform_3, window_bounds = array<i64: 1, 8, 8, 8>}]} {
    %c0 = arith.constant 0 : index
    %c0_0 = arith.constant 0 : index
    %c0_1 = arith.constant 0 : index
    %c0_2 = arith.constant 0 : index
    %c0_3 = arith.constant 0 : index
    %0 = vector.load %arg1[%c0, %c0_0, %c0_1, %c0_2, %c0_3] : memref<1x4x9x9x4xf32, #tpu.memory_space<vmem>>, vector<1x1x9x9x4xf32>
    %1 = vector.shape_cast %0 : vector<1x1x9x9x4xf32> to vector<9x9x4xf32>
    %c0_4 = arith.constant 0 : index
    %c1 = arith.constant 1 : index
    %c0_5 = arith.constant 0 : index
    %c0_6 = arith.constant 0 : index
    %c0_7 = arith.constant 0 : index
    %2 = vector.load %arg1[%c0_4, %c1, %c0_5, %c0_6, %c0_7] : memref<1x4x9x9x4xf32, #tpu.memory_space<vmem>>, vector<1x1x9x9x4xf32>
    %3 = vector.shape_cast %2 : vector<1x1x9x9x4xf32> to vector<9x9x4xf32>
    %c0_8 = arith.constant 0 : index
    %c2 = arith.constant 2 : index
    %c0_9 = arith.constant 0 : index
    %c0_10 = arith.constant 0 : index
    %c0_11 = arith.constant 0 : index
    %4 = vector.load %arg1[%c0_8, %c2, %c0_9, %c0_10, %c0_11] : memref<1x4x9x9x4xf32, #tpu.memory_space<vmem>>, vector<1x1x9x9x4xf32>
    %5 = vector.shape_cast %4 : vector<1x1x9x9x4xf32> to vector<9x9x4xf32>
    %c0_12 = arith.constant 0 : index
    %c3 = arith.constant 3 : index
    %c0_13 = arith.constant 0 : index
    %c0_14 = arith.constant 0 : index
    %c0_15 = arith.constant 0 : index
    %6 = vector.load %arg1[%c0_12, %c3, %c0_13, %c0_14, %c0_15] : memref<1x4x9x9x4xf32, #tpu.memory_space<vmem>>, vector<1x1x9x9x4xf32>
    %7 = vector.shape_cast %6 : vector<1x1x9x9x4xf32> to vector<9x9x4xf32>
    %cst = arith.constant 0.000000e+00 : f32
    %8 = vector.broadcast %cst : f32 to vector<8x8x8xf32>
    %9 = vector.extract_strided_slice %1 {offsets = [0, 0, 0], sizes = [8, 8, 4], strides = [1, 1, 1]} : vector<9x9x4xf32> to vector<8x8x4xf32>
    %c0_16 = arith.constant 0 : index
    %c0_17 = arith.constant 0 : index
    %c0_18 = arith.constant 0 : index
    %10 = vector.load %arg2[%c0_16, %c0_17, %c0_18] : memref<9x4x8xf32, #tpu.memory_space<vmem>>, vector<1x4x8xf32>
    %11 = vector.shape_cast %10 : vector<1x4x8xf32> to vector<4x8xf32>
    %12 = arith.truncf %11 : vector<4x8xf32> to vector<4x8xbf16>
    %13 = vector.shape_cast %12 : vector<4x8xbf16> to vector<1x4x8xbf16>
    %14 = vector.broadcast %13 : vector<1x4x8xbf16> to vector<8x4x8xbf16>
    %15 = arith.truncf %9 : vector<8x8x4xf32> to vector<8x8x4xbf16>
    "tpu.trace_start"() <{level = 10 : i32, message = "hwc,hcd->hwd"}> : () -> ()
    %cst_19 = arith.constant dense<0.000000e+00> : vector<8x8x8xf32>
    %16 = tpu.matmul %15, %14, %cst_19 {dimension_numbers = #tpu.dot_dimension_numbers<[2], [1], [1], [2], [0, 0, 0, 1, 1, 2], [0], [0]>} : vector<8x8x4xbf16>, vector<8x4x8xbf16>, vector<8x8x8xf32> -> vector<8x8x8xf32>
    "tpu.trace_stop"() : () -> ()
    %17 = arith.addf %8, %16 : vector<8x8x8xf32>
    %18 = vector.extract_strided_slice %3 {offsets = [0, 0, 0], sizes = [8, 8, 4], strides = [1, 1, 1]} : vector<9x9x4xf32> to vector<8x8x4xf32>
    %c1_20 = arith.constant 1 : index
    %c0_21 = arith.constant 0 : index
    %c0_22 = arith.constant 0 : index
    %19 = vector.load %arg2[%c1_20, %c0_21, %c0_22] : memref<9x4x8xf32, #tpu.memory_space<vmem>>, vector<1x4x8xf32>
    %20 = vector.shape_cast %19 : vector<1x4x8xf32> to vector<4x8xf32>
    %21 = arith.truncf %20 : vector<4x8xf32> to vector<4x8xbf16>
    %22 = vector.shape_cast %21 : vector<4x8xbf16> to vector<1x4x8xbf16>
    %23 = vector.broadcast %22 : vector<1x4x8xbf16> to vector<8x4x8xbf16>
    %24 = arith.truncf %18 : vector<8x8x4xf32> to vector<8x8x4xbf16>
    "tpu.trace_start"() <{level = 10 : i32, message = "hwc,hcd->hwd"}> : () -> ()
    %cst_23 = arith.constant dense<0.000000e+00> : vector<8x8x8xf32>
    %25 = tpu.matmul %24, %23, %cst_23 {dimension_numbers = #tpu.dot_dimension_numbers<[2], [1], [1], [2], [0, 0, 0, 1, 1, 2], [0], [0]>} : vector<8x8x4xbf16>, vector<8x4x8xbf16>, vector<8x8x8xf32> -> vector<8x8x8xf32>
    "tpu.trace_stop"() : () -> ()
    %26 = arith.addf %17, %25 : vector<8x8x8xf32>
    %27 = vector.extract_strided_slice %1 {offsets = [0, 1, 0], sizes = [8, 8, 4], strides = [1, 1, 1]} : vector<9x9x4xf32> to vector<8x8x4xf32>
    %c2_24 = arith.constant 2 : index
    %c0_25 = arith.constant 0 : index
    %c0_26 = arith.constant 0 : index
    %28 = vector.load %arg2[%c2_24, %c0_25, %c0_26] : memref<9x4x8xf32, #tpu.memory_space<vmem>>, vector<1x4x8xf32>
    %29 = vector.shape_cast %28 : vector<1x4x8xf32> to vector<4x8xf32>
    %30 = arith.truncf %29 : vector<4x8xf32> to vector<4x8xbf16>
    %31 = vector.shape_cast %30 : vector<4x8xbf16> to vector<1x4x8xbf16>
    %32 = vector.broadcast %31 : vector<1x4x8xbf16> to vector<8x4x8xbf16>
    %33 = arith.truncf %27 : vector<8x8x4xf32> to vector<8x8x4xbf16>
    "tpu.trace_start"() <{level = 10 : i32, message = "hwc,hcd->hwd"}> : () -> ()
    %cst_27 = arith.constant dense<0.000000e+00> : vector<8x8x8xf32>
    %34 = tpu.matmul %33, %32, %cst_27 {dimension_numbers = #tpu.dot_dimension_numbers<[2], [1], [1], [2], [0, 0, 0, 1, 1, 2], [0], [0]>} : vector<8x8x4xbf16>, vector<8x4x8xbf16>, vector<8x8x8xf32> -> vector<8x8x8xf32>
    "tpu.trace_stop"() : () -> ()
    %35 = arith.addf %26, %34 : vector<8x8x8xf32>
    %36 = vector.extract_strided_slice %5 {offsets = [0, 0, 0], sizes = [8, 8, 4], strides = [1, 1, 1]} : vector<9x9x4xf32> to vector<8x8x4xf32>
    %c3_28 = arith.constant 3 : index
    %c0_29 = arith.constant 0 : index
    %c0_30 = arith.constant 0 : index
    %37 = vector.load %arg2[%c3_28, %c0_29, %c0_30] : memref<9x4x8xf32, #tpu.memory_space<vmem>>, vector<1x4x8xf32>
    %38 = vector.shape_cast %37 : vector<1x4x8xf32> to vector<4x8xf32>
    %39 = arith.truncf %38 : vector<4x8xf32> to vector<4x8xbf16>
    %40 = vector.shape_cast %39 : vector<4x8xbf16> to vector<1x4x8xbf16>
    %41 = vector.broadcast %40 : vector<1x4x8xbf16> to vector<8x4x8xbf16>
    %42 = arith.truncf %36 : vector<8x8x4xf32> to vector<8x8x4xbf16>
    "tpu.trace_start"() <{level = 10 : i32, message = "hwc,hcd->hwd"}> : () -> ()
    %cst_31 = arith.constant dense<0.000000e+00> : vector<8x8x8xf32>
    %43 = tpu.matmul %42, %41, %cst_31 {dimension_numbers = #tpu.dot_dimension_numbers<[2], [1], [1], [2], [0, 0, 0, 1, 1, 2], [0], [0]>} : vector<8x8x4xbf16>, vector<8x4x8xbf16>, vector<8x8x8xf32> -> vector<8x8x8xf32>
    "tpu.trace_stop"() : () -> ()
    %44 = arith.addf %35, %43 : vector<8x8x8xf32>
    %45 = vector.extract_strided_slice %7 {offsets = [0, 0, 0], sizes = [8, 8, 4], strides = [1, 1, 1]} : vector<9x9x4xf32> to vector<8x8x4xf32>
    %c4 = arith.constant 4 : index
    %c0_32 = arith.constant 0 : index
    %c0_33 = arith.constant 0 : index
    %46 = vector.load %arg2[%c4, %c0_32, %c0_33] : memref<9x4x8xf32, #tpu.memory_space<vmem>>, vector<1x4x8xf32>
    %47 = vector.shape_cast %46 : vector<1x4x8xf32> to vector<4x8xf32>
    %48 = arith.truncf %47 : vector<4x8xf32> to vector<4x8xbf16>
    %49 = vector.shape_cast %48 : vector<4x8xbf16> to vector<1x4x8xbf16>
    %50 = vector.broadcast %49 : vector<1x4x8xbf16> to vector<8x4x8xbf16>
    %51 = arith.truncf %45 : vector<8x8x4xf32> to vector<8x8x4xbf16>
    "tpu.trace_start"() <{level = 10 : i32, message = "hwc,hcd->hwd"}> : () -> ()
    %cst_34 = arith.constant dense<0.000000e+00> : vector<8x8x8xf32>
    %52 = tpu.matmul %51, %50, %cst_34 {dimension_numbers = #tpu.dot_dimension_numbers<[2], [1], [1], [2], [0, 0, 0, 1, 1, 2], [0], [0]>} : vector<8x8x4xbf16>, vector<8x4x8xbf16>, vector<8x8x8xf32> -> vector<8x8x8xf32>
    "tpu.trace_stop"() : () -> ()
    %53 = arith.addf %44, %52 : vector<8x8x8xf32>
    %54 = vector.extract_strided_slice %5 {offsets = [0, 1, 0], sizes = [8, 8, 4], strides = [1, 1, 1]} : vector<9x9x4xf32> to vector<8x8x4xf32>
    %c5 = arith.constant 5 : index
    %c0_35 = arith.constant 0 : index
    %c0_36 = arith.constant 0 : index
    %55 = vector.load %arg2[%c5, %c0_35, %c0_36] : memref<9x4x8xf32, #tpu.memory_space<vmem>>, vector<1x4x8xf32>
    %56 = vector.shape_cast %55 : vector<1x4x8xf32> to vector<4x8xf32>
    %57 = arith.truncf %56 : vector<4x8xf32> to vector<4x8xbf16>
    %58 = vector.shape_cast %57 : vector<4x8xbf16> to vector<1x4x8xbf16>
    %59 = vector.broadcast %58 : vector<1x4x8xbf16> to vector<8x4x8xbf16>
    %60 = arith.truncf %54 : vector<8x8x4xf32> to vector<8x8x4xbf16>
    "tpu.trace_start"() <{level = 10 : i32, message = "hwc,hcd->hwd"}> : () -> ()
    %cst_37 = arith.constant dense<0.000000e+00> : vector<8x8x8xf32>
    %61 = tpu.matmul %60, %59, %cst_37 {dimension_numbers = #tpu.dot_dimension_numbers<[2], [1], [1], [2], [0, 0, 0, 1, 1, 2], [0], [0]>} : vector<8x8x4xbf16>, vector<8x4x8xbf16>, vector<8x8x8xf32> -> vector<8x8x8xf32>
    "tpu.trace_stop"() : () -> ()
    %62 = arith.addf %53, %61 : vector<8x8x8xf32>
    %63 = vector.extract_strided_slice %1 {offsets = [1, 0, 0], sizes = [8, 8, 4], strides = [1, 1, 1]} : vector<9x9x4xf32> to vector<8x8x4xf32>
    %c6 = arith.constant 6 : index
    %c0_38 = arith.constant 0 : index
    %c0_39 = arith.constant 0 : index
    %64 = vector.load %arg2[%c6, %c0_38, %c0_39] : memref<9x4x8xf32, #tpu.memory_space<vmem>>, vector<1x4x8xf32>
    %65 = vector.shape_cast %64 : vector<1x4x8xf32> to vector<4x8xf32>
    %66 = arith.truncf %65 : vector<4x8xf32> to vector<4x8xbf16>
    %67 = vector.shape_cast %66 : vector<4x8xbf16> to vector<1x4x8xbf16>
    %68 = vector.broadcast %67 : vector<1x4x8xbf16> to vector<8x4x8xbf16>
    %69 = arith.truncf %63 : vector<8x8x4xf32> to vector<8x8x4xbf16>
    "tpu.trace_start"() <{level = 10 : i32, message = "hwc,hcd->hwd"}> : () -> ()
    %cst_40 = arith.constant dense<0.000000e+00> : vector<8x8x8xf32>
    %70 = tpu.matmul %69, %68, %cst_40 {dimension_numbers = #tpu.dot_dimension_numbers<[2], [1], [1], [2], [0, 0, 0, 1, 1, 2], [0], [0]>} : vector<8x8x4xbf16>, vector<8x4x8xbf16>, vector<8x8x8xf32> -> vector<8x8x8xf32>
    "tpu.trace_stop"() : () -> ()
    %71 = arith.addf %62, %70 : vector<8x8x8xf32>
    %72 = vector.extract_strided_slice %3 {offsets = [1, 0, 0], sizes = [8, 8, 4], strides = [1, 1, 1]} : vector<9x9x4xf32> to vector<8x8x4xf32>
    %c7 = arith.constant 7 : index
    %c0_41 = arith.constant 0 : index
    %c0_42 = arith.constant 0 : index
    %73 = vector.load %arg2[%c7, %c0_41, %c0_42] : memref<9x4x8xf32, #tpu.memory_space<vmem>>, vector<1x4x8xf32>
    %74 = vector.shape_cast %73 : vector<1x4x8xf32> to vector<4x8xf32>
    %75 = arith.truncf %74 : vector<4x8xf32> to vector<4x8xbf16>
    %76 = vector.shape_cast %75 : vector<4x8xbf16> to vector<1x4x8xbf16>
    %77 = vector.broadcast %76 : vector<1x4x8xbf16> to vector<8x4x8xbf16>
    %78 = arith.truncf %72 : vector<8x8x4xf32> to vector<8x8x4xbf16>
    "tpu.trace_start"() <{level = 10 : i32, message = "hwc,hcd->hwd"}> : () -> ()
    %cst_43 = arith.constant dense<0.000000e+00> : vector<8x8x8xf32>
    %79 = tpu.matmul %78, %77, %cst_43 {dimension_numbers = #tpu.dot_dimension_numbers<[2], [1], [1], [2], [0, 0, 0, 1, 1, 2], [0], [0]>} : vector<8x8x4xbf16>, vector<8x4x8xbf16>, vector<8x8x8xf32> -> vector<8x8x8xf32>
    "tpu.trace_stop"() : () -> ()
    %80 = arith.addf %71, %79 : vector<8x8x8xf32>
    %81 = vector.extract_strided_slice %1 {offsets = [1, 1, 0], sizes = [8, 8, 4], strides = [1, 1, 1]} : vector<9x9x4xf32> to vector<8x8x4xf32>
    %c8 = arith.constant 8 : index
    %c0_44 = arith.constant 0 : index
    %c0_45 = arith.constant 0 : index
    %82 = vector.load %arg2[%c8, %c0_44, %c0_45] : memref<9x4x8xf32, #tpu.memory_space<vmem>>, vector<1x4x8xf32>
    %83 = vector.shape_cast %82 : vector<1x4x8xf32> to vector<4x8xf32>
    %84 = arith.truncf %83 : vector<4x8xf32> to vector<4x8xbf16>
    %85 = vector.shape_cast %84 : vector<4x8xbf16> to vector<1x4x8xbf16>
    %86 = vector.broadcast %85 : vector<1x4x8xbf16> to vector<8x4x8xbf16>
    %87 = arith.truncf %81 : vector<8x8x4xf32> to vector<8x8x4xbf16>
    "tpu.trace_start"() <{level = 10 : i32, message = "hwc,hcd->hwd"}> : () -> ()
    %cst_46 = arith.constant dense<0.000000e+00> : vector<8x8x8xf32>
    %88 = tpu.matmul %87, %86, %cst_46 {dimension_numbers = #tpu.dot_dimension_numbers<[2], [1], [1], [2], [0, 0, 0, 1, 1, 2], [0], [0]>} : vector<8x8x4xbf16>, vector<8x4x8xbf16>, vector<8x8x8xf32> -> vector<8x8x8xf32>
    "tpu.trace_stop"() : () -> ()
    %89 = arith.addf %80, %88 : vector<8x8x8xf32>
    %c0_47 = arith.constant 0 : index
    %c0_48 = arith.constant 0 : index
    %c0_49 = arith.constant 0 : index
    %90 = vector.load %arg3[%c0_47, %c0_48, %c0_49] : memref<1x1x8xf32, #tpu.memory_space<vmem>>, vector<1x1x8xf32>
    %91 = vector.broadcast %90 : vector<1x1x8xf32> to vector<8x8x8xf32>
    %92 = arith.addf %89, %91 : vector<8x8x8xf32>
    %cst_50 = arith.constant 0.000000e+00 : f32
    %93 = vector.broadcast %cst_50 : f32 to vector<8x8x8xf32>
    %94 = arith.maximumf %92, %93 : vector<8x8x8xf32>
    %c0_51 = arith.constant 0 : index
    %c0_52 = arith.constant 0 : index
    %c0_53 = arith.constant 0 : index
    %c0_54 = arith.constant 0 : index
    %95 = vector.load %arg4[%c0_51, %c0_52, %c0_53, %c0_54] : memref<1x8x8x8xf32, #tpu.memory_space<vmem>>, vector<1x8x8x8xf32>
    %96 = vector.shape_cast %95 : vector<1x8x8x8xf32> to vector<8x8x8xf32>
    %97 = vector.shape_cast %94 : vector<8x8x8xf32> to vector<1x8x8x8xf32>
    tpu.vector_store %arg4[%c0_51, %c0_52, %c0_53, %c0_54], %97 {strides = array<i32>} : memref<1x8x8x8xf32, #tpu.memory_space<vmem>>, vector<1x8x8x8xf32>,
    return
  }
  func.func @transform_0(%arg0: i32) -> (i32, i32, i32, i32, i32) {
    %c0_i32 = arith.constant 0 : i32
    %c0_i32_0 = arith.constant 0 : i32
    %c0_i32_1 = arith.constant 0 : i32
    %c0_i32_2 = arith.constant 0 : i32
    %c0_i32_3 = arith.constant 0 : i32
    return %arg0, %c0_i32, %c0_i32_0, %c0_i32_1, %c0_i32_2 : i32, i32, i32, i32, i32
  }
  func.func @transform_1(%arg0: i32) -> (i32, i32, i32) {
    %c0_i32 = arith.constant 0 : i32
    %c0_i32_0 = arith.constant 0 : i32
    %c0_i32_1 = arith.constant 0 : i32
    %c0_i32_2 = arith.constant 0 : i32
    return %c0_i32, %c0_i32_0, %c0_i32_1 : i32, i32, i32
  }
  func.func @transform_2(%arg0: i32) -> (i32, i32, i32) {
    %c0_i32 = arith.constant 0 : i32
    %c0_i32_0 = arith.constant 0 : i32
    %c0_i32_1 = arith.constant 0 : i32
    %c0_i32_2 = arith.constant 0 : i32
    return %c0_i32, %c0_i32_0, %c0_i32_1 : i32, i32, i32
  }
  func.func @transform_3(%arg0: i32) -> (i32, i32, i32, i32) {
    %c0_i32 = arith.constant 0 : i32
    %c0_i32_0 = arith.constant 0 : i32
    %c0_i32_1 = arith.constant 0 : i32
    %c0_i32_2 = arith.constant 0 : i32
    return %arg0, %c0_i32, %c0_i32_0, %c0_i32_1 : i32, i32, i32, i32
  }
}

</mosaic_0001>

<bundles_post_ra>
// kernel: tpu_custom_call.1
= control target key start
LH: loop header
LB: loop body
LE: loop exit
PB: predicated region body
PF: predicated region fallthrough
CT: control target
= control target key end

     0   :  { %8 = vsyncpa [#allocation3], 0  ;;  %s5178_s0 = inlined_call_operand.vmem [shape: f32[2,4,9,9,4], index: 0, kind: input, shape index: {}]   ;;  %s5179_s1 = inlined_call_operand.vmem [shape: f32[9,4,8], index: 1, kind: input, shape index: {}]   ;;  %s5180_s2 = inlined_call_operand.vmem [shape: f32[1,1,8], index: 2, kind: input, shape index: {}]   ;;  %s5181_s3 = inlined_call_operand.hbm [shape: f32[2,8,8,8], index: 3, kind: output, shape index: {}]  }
   0x1   :  { %10 = vsyncpa [#allocation3 + $0x1], 0  ;;  %s4481_s12 = smov 0   ;;  %s4483_s13 = smov 0  }
   0x2   :  { %s4485_s14 = smov 0   ;;  %s4487_s15 = smov 0  }
   0x3 LB: > { %s4502_s16 = sadd.s32 4294967295, %s4454_s15   ;;  %s3646_s17 = sadd.s32 4294967294, %s4454_s15   ;;  %s4454_s15 = sphi %s4487_s15, %s5187_s15   ;;  %s4450_s14 = sphi %s4485_s14, %s5186_s14   ;;  %s4446_s13 = sphi %s4483_s13, %s5185_s13   ;;  %s4442_s12 = sphi %s4481_s12, %s5184_s12  }
   0x4   : > { %s4506_s18 = sadd.s32 1, %s4454_s15   ;;  %s91_s19 = sadd.s32 1, %s4450_s14 }
   0x5   : > { %s88_s20 = ssub.s32 %s4454_s15, %s4506_s18  ;;  %p101_p0 = scmp.ne.s32.totalorder %s4450_s14, %s4446_s13 }
   0x6   : > { %p89_p1 = scmp.eq.s32.totalorder %s88_s20, 0  ;;  %p102_p2 = scmp.eq.s32.totalorder %s4502_s16, 1 }
   0x7   : > { %p107_p3 = scmp.ne.s32.totalorder %s4446_s13, %s4442_s12  ;;  %p108_p4 = scmp.eq.s32.totalorder %s3646_s17, 1 }
   0x8   : > { %s4517_s21 = scalar_select %p89_p1, %s4450_s14, %s91_s19  }
   0x9   : > { %p4519_p5 = por %p102_p2, %p101_p0  ;;  %p4523_p6 = por %p108_p4, %p107_p3 }
   0xa   : > { %p3649_p7 = scmp.ge.s32.totalorder %s4454_s15, 1  ;;  %p140_p8 = scmp.lt.s32.totalorder %s4454_s15, 3 }
   0xc   : > { %p141_p9 = pnand %p3649_p7, %p140_p8 }
   0xd   : > { %v3685_v0 = vld [vmem:[%s5179_s1 + $0x4] sm:$0xf] (!%p141_p9)  ;;  %vm249_vm0 = vcmask (!%p141_p9), 1041408   ;;  %p164_p10 = scmp.lt.s32.totalorder (!%p141_p9), %s4502_s16, 1  ;;  %v4456_v1 = vmov (!%p141_p9), 0.0   ;;  %vm4457_vm1 = vmmov (!%p141_p9), 0  }
   0xe   : > { %144 = sbr.rel (%p141_p9) target bundleno = 542 (0x21e), region = 32  ;;  %3916 = vmatprep.subr.bf16.mxu0 (!%p141_p9), %v4456_v1  ;;  %3922 = vmatprep.subr.bf16.mxu1 (!%p141_p9), %v4456_v1  ;;  %v236_v2 = vpack.c.bf16 (!%p141_p9), %v3685_v0, %v3685_v0  ;;  %vm245_vm2 = vcmask (!%p141_p9), 31744   ;;  %v224_v16 = vld [vmem:[%s5179_s1] sm:$0xf] (!%p141_p9)  ;;  %v3702_v37 = vld [vmem:[%s5179_s1 + $0x8] sm:$0xf] (!%p141_p9) }
   0xf   : > { %3918 = vmatprep.mubr.msk.bf16.mxu0 (!%p141_p9), %vm4457_vm1, %v4456_v1  ;;  %3924 = vmatprep.mubr.msk.bf16.mxu1 (!%p141_p9), %vm4457_vm1, %v4456_v1  ;;  %v225_v19 = vpack.c.bf16 (!%p141_p9), %v224_v16, %v224_v16  ;;  %v943_v42 = vpack.c.bf16 (!%p141_p9), %v3702_v37, %v3702_v37  ;;  %s161_s29 = sand.u32 (!%p141_p9), 1, %s4446_s13   ;;  %vm3561_vm3 = vcmask (!%p141_p9), 64512   ;;  %s3771_s7 = sshll.u32 (!%p141_p9), %s4502_s16, 10 }
  0x10   : > { %v251_v3 = vsel (!%p141_p9), %vm249_vm0, %v236_v2, 0  ;;  %s3650_s5 = sshll.u32 (!%p141_p9), %s161_s29, 6  ;;  %s5127_s11 = scalar_lea.hbm (!%p141_p9), %s5181_s3, %s3771_s7 }
  0x11   : > { %3917 = vmatpush3.bf16.msra.mxu0 (!%p141_p9), %v251_v3  ;;  %3923 = vmatpush3.bf16.msra.mxu1 (!%p141_p9), %v251_v3  ;;  %v598_v22 = vsel (!%p141_p9), %vm249_vm0, %v225_v19, 0  ;;  %v4672_v49 = vsel (!%p141_p9), %vm249_vm0, %v943_v42, 0  ;;  %s5106_s6 = scalar_lea.vmem (!%p141_p9), [#allocation2], %s3650_s5  ;;  %s4458_s19 = smov (!%p141_p9), [#allocation2]  }
  0x12   : > { %3928 = vmatprep.subr.bf16.mxu0 (!%p141_p9), %v4456_v1  ;;  %3934 = vmatprep.subr.bf16.mxu1 (!%p141_p9), %v4456_v1  ;;  %s3584_s8 = sshll.u32 (!%p141_p9), %s5106_s6, 4  ;;  %s4396_s20 = sshll.u32 (!%p141_p9), %s4458_s19, 4  ;;  %s5129_s8 = int_to_ptr.vmem [resolvable:$true] %s3584_s8  ;;  %s4397_s20 = int_to_ptr.vmem [resolvable:$false] %s4396_s20 }
  0x13   : > { %s4392_s17 = scalar_lea.vmem (!%p141_p9), %s5129_s8, 1024  ;;  %s4398_s24 = scalar_lea.vmem (!%p141_p9), %s4397_s20, 2048 }
  0x14   : > { %p4393_p11 = scmp.ne.s32.totalorder (!%p141_p9), %s5129_s8, %s4392_s17  ;;  %p4399_p0 = scmp.lt.s32.totalorder (!%p141_p9), %s5129_s8, %s4397_s20 }
  0x15   : > { %s165_s26 = scalar_select %p164_p10, %s4502_s16, 1 }
  0x16   : > { %s5137_s16 = scalar_lea.sflag [#allocation3], %s161_s29  ;;  %p4394_p12 = pnand %p4393_p11, %p4519_p5 }
  0x17   : > { %s4348_s27 = smul.u32 576, %s165_s26  ;;  %p4400_p1 = scmp.lt.s32.totalorder %s4398_s24, %s4392_s17 }
  0x18   : > { %p4395_p13 = pneg %p4394_p12 }
  0x19   : > { %s4546_s30 = scalar_lea.vmem %s5178_s0, %s4348_s27  ;;  %p4401_p2 = por %p4400_p1, %p4399_p0 }
  0x1a   : > { %v3652_v4 = vld [vmem:[%s4546_s30 + $0x90] sm:$0xff]  ;;  %v3653_v5 = vld [vmem:[%s4546_s30 + $0xa0] sm:$0xff]  ;;  %v171_v35 = vld [vmem:[%s4546_s30 + $0x8] sm:$0x1] }
  0x1b   : > { %v237_v6 = vpack.c.bf16 %v3652_v4, %v3652_v4  ;;  %v4550_v7 = vpack.c.bf16 %v3653_v5, %v3653_v5  ;;  %v3654_v8 = vld [vmem:[%s4546_s30 + $0xb0] sm:$0xff]  ;;  %v3655_v9 = vld [vmem:[%s4546_s30 + $0xc0] sm:$0xff]  ;;  %v173_v36 = vld [vmem:[%s4546_s30 + $0x18] sm:$0x1]  ;;  %p4402_p3 = pnand %p4401_p2, %p4395_p13 }
  0x1c   : > { %v4563_v10 = vpack.c.bf16 %v3654_v8, %v3654_v8  ;;  %v4565_v11 = vpack.c.bf16 %v3655_v9, %v3655_v9  ;;  %v3656_v12 = vld [vmem:[%s4546_s30 + $0xd0] sm:$0xff]  ;;  %v3657_v13 = vld [vmem:[%s4546_s30 + $0xe0] sm:$0xff]  ;;  %v175_v43 = vld [vmem:[%s4546_s30 + $0x28] sm:$0x1] }
  0x1d   : > { %3919 = vmatmul.mubr.msk.bf16.vlgmr.msra.gmra.mrb[0].mxu0 %vm245_vm2, %v237_v6  ;;  %3925 = vmatmul.mubr.msk.bf16.vlgmr.msra.gmra.mrb[0].mxu1 %vm245_vm2, %v4550_v7  ;;  %v4579_v14 = vpack.c.bf16 %v3656_v12, %v3656_v12  ;;  %v4581_v15 = vpack.c.bf16 %v3657_v13, %v3657_v13  ;;  %v3658_v17 = vld [vmem:[%s4546_s30 + $0xf0] sm:$0xff]  ;;  %v3659_v18 = vld [vmem:[%s4546_s30 + $0x100] sm:$0xff]  ;;  %v177_v44 = vld [vmem:[%s4546_s30 + $0x38] sm:$0x1] }
  0x1e   : > { %3929 = vmatpush3.bf16.msra.mxu0 %v251_v3  ;;  %3935 = vmatpush3.bf16.msra.mxu1 %v251_v3  ;;  %v4598_v20 = vpack.c.bf16 %v3658_v17, %v3658_v17  ;;  %v4600_v21 = vpack.c.bf16 %v3659_v18, %v3659_v18  ;;  %v170_v23 = vld [vmem:[%s4546_s30] sm:$0xff]  ;;  %v172_v24 = vld [vmem:[%s4546_s30 + $0x10] sm:$0xff]  ;;  %v179_v56 = vld [vmem:[%s4546_s30 + $0x48] sm:$0x1] }
  0x1f   : > { %3930 = vmatprep.mubr.msk.bf16.mxu0 %vm4457_vm1, %v4456_v1  ;;  %3936 = vmatprep.mubr.msk.bf16.mxu1 %vm4457_vm1, %v4456_v1  ;;  %v226_v25 = vpack.c.bf16 %v170_v23, %v170_v23  ;;  %v4615_v26 = vpack.c.bf16 %v172_v24, %v172_v24  ;;  %v174_v27 = vld [vmem:[%s4546_s30 + $0x20] sm:$0xff]  ;;  %v176_v28 = vld [vmem:[%s4546_s30 + $0x30] sm:$0xff]  ;;  %v944_v38 = vpack.c.bf16 %v171_v35, %v170_v23  ;;  %v181_v57 = vld [vmem:[%s4546_s30 + $0x58] sm:$0x1] }
  0x20   : > { %3940 = vmatprep.subr.bf16.mxu0 %v4456_v1  ;;  %3946 = vmatprep.subr.bf16.mxu1 %v4456_v1  ;;  %v4628_v29 = vpack.c.bf16 %v174_v27, %v174_v27  ;;  %v4630_v30 = vpack.c.bf16 %v176_v28, %v176_v28  ;;  %v178_v31 = vld [vmem:[%s4546_s30 + $0x40] sm:$0xff]  ;;  %v180_v32 = vld [vmem:[%s4546_s30 + $0x50] sm:$0xff]  ;;  %v945_v39 = vpack.c.bf16 %v173_v36, %v172_v24  ;;  %v183_v5 = vld [vmem:[%s4546_s30 + $0x68] sm:$0x1] }
  0x21   : > { %v4644_v33 = vpack.c.bf16 %v178_v31, %v178_v31  ;;  %v4646_v34 = vpack.c.bf16 %v180_v32, %v180_v32  ;;  %v182_v40 = vld [vmem:[%s4546_s30 + $0x60] sm:$0xff]  ;;  %v184_v41 = vld [vmem:[%s4546_s30 + $0x70] sm:$0xff]  ;;  %v955_v47 = vshll.u32 %v944_v38, 16  ;;  %v946_v50 = vpack.c.bf16 %v175_v43, %v174_v27  ;;  %v185_v6 = vld [vmem:[%s4546_s30 + $0x78] sm:$0x1] }
  0x22   : > { %v4667_v45 = vpack.c.bf16 %v182_v40, %v182_v40  ;;  %v4669_v46 = vpack.c.bf16 %v184_v41, %v184_v41  ;;  %v1008_v48 = vshll.u32 %v945_v39, 16  ;;  %v947_v51 = vpack.c.bf16 %v177_v44, %v176_v28  ;;  %v4748_v42 = vld [vmem:[%s4546_s30 + $0x120] sm:$0xff]  ;;  %v4751_v43 = vld [vmem:[%s4546_s30 + $0x130] sm:$0xff] }
  0x23   : > { %v953_v52 = vshrl.u32 %v944_v38, 16  ;;  %v957_v53 = vrot.slane %v955_v47, 1  ;;  %v1006_v54 = vshrl.u32 %v945_v39, 16  ;;  %v1058_v60 = vshll.u32 %v946_v50, 16 }
  0x24   : > { %v1010_v55 = vrot.slane %v1008_v48, 1  ;;  %v1108_v61 = vshll.u32 %v947_v51, 16  ;;  %v948_v62 = vpack.c.bf16 %v179_v56, %v178_v31  ;;  %v949_v63 = vpack.c.bf16 %v181_v57, %v180_v32  ;;  %v3711_v31 = vld [vmem:[%s5179_s1 + $0xc] sm:$0xf]  ;;  %v4766_v48 = vld [vmem:[%s4546_s30 + $0x140] sm:$0xff] }
  0x25   : > { %3931 = vmatmul.mubr.msk.bf16.vlgmr.msra.gmra.mrb[4].mxu0 %vm245_vm2, %v4563_v10  ;;  %3937 = vmatmul.mubr.msk.bf16.vlgmr.msra.gmra.mrb[4].mxu1 %vm245_vm2, %v4565_v11  ;;  %v958_v58 = vor.u32 %v957_v53, %v953_v52  ;;  %v1056_v0 = vshrl.u32 %v946_v50, 16  ;;  %v1060_v2 = vrot.slane %v1058_v60, 1  ;;  %v950_v16 = vpack.c.bf16 %v183_v5, %v182_v40  ;;  %v4784_v52 = vld [vmem:[%s4546_s30 + $0x160] sm:$0xff]  ;;  %v4787_v53 = vld [vmem:[%s4546_s30 + $0x170] sm:$0xff] }
  0x26   : > { %3941 = vmatpush3.bf16.msra.mxu0 %v251_v3  ;;  %3947 = vmatpush3.bf16.msra.mxu1 %v251_v3  ;;  %v4688_v59 = vor.u32 %v1010_v55, %v1006_v54  ;;  %v1110_v4 = vrot.slane %v1108_v61, 1  ;;  %v1158_v12 = vshll.u32 %v948_v62, 16  ;;  %v1208_v13 = vshll.u32 %v949_v63, 16  ;;  %v3720_v56 = vld [vmem:[%s5179_s1 + $0x10] sm:$0xf]  ;;  %v4805_v57 = vld [vmem:[%s4546_s30 + $0x180] sm:$0xff] }
  0x27   : > { %3942 = vmatprep.mubr.msk.bf16.mxu0 %vm4457_vm1, %v4456_v1  ;;  %3948 = vmatprep.mubr.msk.bf16.mxu1 %vm4457_vm1, %v4456_v1  ;;  %v4703_v8 = vor.u32 %v1060_v2, %v1056_v0  ;;  %v951_v17 = vpack.c.bf16 %v185_v6, %v184_v41  ;;  %v1156_v18 = vshrl.u32 %v948_v62, 16  ;;  %v1258_v27 = vshll.u32 %v950_v16, 16  ;;  %v3677_v0 = vld [vmem:[%s4546_s30 + $0x1b0] sm:$0xff]  ;;  %v3678_v2 = vld [vmem:[%s4546_s30 + $0x1c0] sm:$0xff] }
  0x28   : > { %3952 = vmatprep.subr.bf16.mxu0 %v4456_v1  ;;  %3958 = vmatprep.subr.bf16.mxu1 %v4456_v1  ;;  %v1160_v19 = vrot.slane %v1158_v12, 1  ;;  %v1210_v23 = vrot.slane %v1208_v13, 1  ;;  %v1256_v32 = vshrl.u32 %v950_v16, 16  ;;  %v1365_v38 = vpack.c.bf16 %v3711_v31, %v3711_v31  ;;  %v3679_v5 = vld [vmem:[%s4546_s30 + $0x1d0] sm:$0xff]  ;;  %v3680_v6 = vld [vmem:[%s4546_s30 + $0x1e0] sm:$0xff] }
  0x29   : > { %v1308_v28 = vshll.u32 %v951_v17, 16  ;;  %v1260_v35 = vrot.slane %v1258_v27, 1  ;;  %v1306_v36 = vshrl.u32 %v951_v17, 16  ;;  %v1366_v44 = vpack.c.bf16 %v4748_v42, %v4748_v42  ;;  %v3681_v16 = vld [vmem:[%s4546_s30 + $0x1f0] sm:$0xff]  ;;  %v3682_v17 = vld [vmem:[%s4546_s30 + $0x200] sm:$0xff] }
  0x2a   : > { %v4719_v24 = vor.u32 %v1160_v19, %v1156_v18  ;;  %v1378_v41 = vsel %vm249_vm0, %v1365_v38, 0  ;;  %v1367_v47 = vpack.c.bf16 %v4751_v43, %v4751_v43  ;;  %v1368_v50 = vpack.c.bf16 %v4766_v48, %v4766_v48  ;;  %v3729_v27 = vld [vmem:[%s5179_s1 + $0x14] sm:$0xf]  ;;  %v3668_v38 = vld [vmem:[%s4546_s30 + $0x158] sm:$0x1] }
  0x2b   : > { %v1310_v37 = vrot.slane %v1308_v28, 1  ;;  %v4738_v39 = vor.u32 %v1260_v35, %v1256_v32  ;;  %v1370_v54 = vpack.c.bf16 %v4784_v52, %v4784_v52  ;;  %v1371_v55 = vpack.c.bf16 %v4787_v53, %v4787_v53  ;;  %v3683_v32 = vld [vmem:[%s4546_s30 + $0x210] sm:$0xff]  ;;  %v3684_v35 = vld [vmem:[%s4546_s30 + $0x220] sm:$0xff] }
  0x2c   : > { %v1731_v60 = vpack.c.bf16 %v3720_v56, %v3720_v56  ;;  %v1372_v61 = vpack.c.bf16 %v4805_v57, %v4805_v57  ;;  %v1734_v12 = vpack.c.bf16 %v3679_v5, %v3679_v5  ;;  %v1735_v13 = vpack.c.bf16 %v3680_v6, %v3680_v6 }
  0x2d   : > { %3943 = vmatmul.mubr.msk.bf16.vlgmr.msra.gmra.mrb[8].mxu0 %vm245_vm2, %v4579_v14  ;;  %3949 = vmatmul.mubr.msk.bf16.vlgmr.msra.gmra.mrb[8].mxu1 %vm245_vm2, %v4581_v15  ;;  %v4740_v40 = vor.u32 %v1310_v37, %v1306_v36  ;;  %v1736_v18 = vpack.c.bf16 %v3681_v16, %v3681_v16  ;;  %v1737_v19 = vpack.c.bf16 %v3682_v17, %v3682_v17  ;;  %v3666_v37 = vld [vmem:[%s4546_s30 + $0x148] sm:$0x1] }
  0x2e   : > { %3953 = vmatpush3.bf16.msra.mxu0 %v251_v3  ;;  %3959 = vmatpush3.bf16.msra.mxu1 %v251_v3  ;;  %v1106_v3 = vshrl.u32 %v947_v51, 16  ;;  %v2097_v36 = vpack.c.bf16 %v3729_v27, %v3729_v27 }
  0x2f   : > { %3954 = vmatprep.mubr.msk.bf16.mxu0 %vm4457_vm1, %v4456_v1  ;;  %3960 = vmatprep.mubr.msk.bf16.mxu1 %vm4457_vm1, %v4456_v1 }
  0x30   : > { %3964 = vmatprep.subr.bf16.mxu0 %v4456_v1  ;;  %3970 = vmatprep.subr.bf16.mxu1 %v4456_v1  ;;  %v4705_v9 = vor.u32 %v1110_v4, %v1106_v3  ;;  %v1732_v3 = vpack.c.bf16 %v3677_v0, %v3677_v0  ;;  %v1733_v4 = vpack.c.bf16 %v3678_v2, %v3678_v2 }
  0x35   : > { %3955 = vmatmul.mubr.msk.bf16.vlgmr.msra.gmra.mrb[12].mxu0 %vm245_vm2, %v4598_v20  ;;  %3961 = vmatmul.mubr.msk.bf16.vlgmr.msra.gmra.mrb[12].mxu1 %vm245_vm2, %v4600_v21 }
  0x36   : > { %3965 = vmatpush3.bf16.msra.mxu0 %v598_v22  ;;  %3971 = vmatpush3.bf16.msra.mxu1 %v598_v22 }
  0x37   : > { %3966 = vmatprep.mubr.msk.bf16.mxu0 %vm4457_vm1, %v4456_v1  ;;  %3972 = vmatprep.mubr.msk.bf16.mxu1 %vm4457_vm1, %v4456_v1 }
  0x38   : > { %3976 = vmatprep.subr.bf16.mxu0 %v4456_v1  ;;  %3982 = vmatprep.subr.bf16.mxu1 %v4456_v1 }
  0x3d   : > { %3967 = vmatmul.mubr.msk.bf16.vlgmr.msra.gmra.mrb[16].mxu0 %vm245_vm2, %v226_v25  ;;  %3973 = vmatmul.mubr.msk.bf16.vlgmr.msra.gmra.mrb[16].mxu1 %vm245_vm2, %v4615_v26 }
  0x3e   : > { %3977 = vmatpush3.bf16.msra.mxu0 %v598_v22  ;;  %3983 = vmatpush3.bf16.msra.mxu1 %v598_v22 }
  0x3f   : > { %3978 = vmatprep.mubr.msk.bf16.mxu0 %vm4457_vm1, %v4456_v1  ;;  %3984 = vmatprep.mubr.msk.bf16.mxu1 %vm4457_vm1, %v4456_v1 }
  0x40   : > { %3988 = vmatprep.subr.bf16.mxu0 %v4456_v1  ;;  %3994 = vmatprep.subr.bf16.mxu1 %v4456_v1 }
  0x45   : > { %3979 = vmatmul.mubr.msk.bf16.vlgmr.msra.gmra.mrb[20].mxu0 %vm245_vm2, %v4628_v29  ;;  %3985 = vmatmul.mubr.msk.bf16.vlgmr.msra.gmra.mrb[20].mxu1 %vm245_vm2, %v4630_v30 }
  0x46   : > { %3989 = vmatpush3.bf16.msra.mxu0 %v598_v22  ;;  %3995 = vmatpush3.bf16.msra.mxu1 %v598_v22 }
  0x47   : > { %3990 = vmatprep.mubr.msk.bf16.mxu0 %vm4457_vm1, %v4456_v1  ;;  %3996 = vmatprep.mubr.msk.bf16.mxu1 %vm4457_vm1, %v4456_v1 }
  0x48   : > { %4000 = vmatprep.subr.bf16.mxu0 %v4456_v1  ;;  %4006 = vmatprep.subr.bf16.mxu1 %v4456_v1 }
  0x4d   : > { %3991 = vmatmul.mubr.msk.bf16.vlgmr.msra.gmra.mrb[24].mxu0 %vm245_vm2, %v4644_v33  ;;  %3997 = vmatmul.mubr.msk.bf16.vlgmr.msra.gmra.mrb[24].mxu1 %vm245_vm2, %v4646_v34 }
  0x4e   : > { %4001 = vmatpush3.bf16.msra.mxu0 %v598_v22  ;;  %4007 = vmatpush3.bf16.msra.mxu1 %v598_v22  ;;  %v1206_v22 = vshrl.u32 %v949_v63, 16  ;;  %v1744_v63 = vsel %vm249_vm0, %v1731_v60, 0 }
  0x4f   : > { %4002 = vmatprep.mubr.msk.bf16.mxu0 %vm4457_vm1, %v4456_v1  ;;  %4008 = vmatprep.mubr.msk.bf16.mxu1 %vm4457_vm1, %v4456_v1 }
  0x50   : > { %4012 = vmatprep.subr.bf16.mxu0 %v4456_v1  ;;  %4018 = vmatprep.subr.bf16.mxu1 %v4456_v1  ;;  %v4721_v25 = vor.u32 %v1210_v23, %v1206_v22  ;;  %v3662_v22 = vld [vmem:[%s4546_s30 + $0x128] sm:$0x1]  ;;  %v3664_v23 = vld [vmem:[%s4546_s30 + $0x138] sm:$0x1] }
  0x51   : > { %v2098_v28 = vpack.c.bf16 %v3662_v22, %v4748_v42  ;;  %v2099_v31 = vpack.c.bf16 %v3664_v23, %v4751_v43  ;;  %v1739_v42 = vpack.c.bf16 %v3684_v35, %v3684_v35 }
  0x53   : > { %v2109_v43 = vshll.u32 %v2098_v28, 16  ;;  %v2160_v56 = vshrl.u32 %v2099_v31, 16 }
  0x55   : > { %4003 = vmatmul.mubr.msk.bf16.vlgmr.msra.gmra.mrb[28].mxu0 %vm245_vm2, %v4667_v45  ;;  %4009 = vmatmul.mubr.msk.bf16.vlgmr.msra.gmra.mrb[28].mxu1 %vm245_vm2, %v4669_v46 }
  0x56   : > { %4013 = vmatpush3.bf16.msra.mxu0 %v4672_v49  ;;  %4019 = vmatpush3.bf16.msra.mxu1 %v4672_v49 }
  0x57   : > { %4014 = vmatprep.mubr.msk.bf16.mxu0 %vm4457_vm1, %v4456_v1  ;;  %4020 = vmatprep.mubr.msk.bf16.mxu1 %vm4457_vm1, %v4456_v1 }
  0x58   : > { %4024 = vmatprep.subr.bf16.mxu0 %v4456_v1  ;;  %4030 = vmatprep.subr.bf16.mxu1 %v4456_v1 }
  0x5d   : > { %4015 = vmatmul.mubr.msk.bf16.vlgmr.msra.gmra.mrb[32].mxu0 %vm245_vm2, %v958_v58  ;;  %4021 = vmatmul.mubr.msk.bf16.vlgmr.msra.gmra.mrb[32].mxu1 %vm245_vm2, %v4688_v59  ;;  %v4808_v58 = vld [vmem:[%s4546_s30 + $0x190] sm:$0xff] }
  0x5e   : > { %4025 = vmatpush3.bf16.msra.mxu0 %v4672_v49  ;;  %4031 = vmatpush3.bf16.msra.mxu1 %v4672_v49  ;;  %v1373_v62 = vpack.c.bf16 %v4808_v58, %v4808_v58 }
  0x5f   : > { %4026 = vmatprep.mubr.msk.bf16.mxu0 %vm4457_vm1, %v4456_v1  ;;  %4032 = vmatprep.mubr.msk.bf16.mxu1 %vm4457_vm1, %v4456_v1 }
  0x60   : > { %4036 = vmatprep.subr.bf16.mxu0 %v4456_v1  ;;  %4042 = vmatprep.subr.bf16.mxu1 %v4456_v1 }
  0x65   : > { %4027 = vmatmul.mubr.msk.bf16.vlgmr.msra.gmra.mrb[36].mxu0 %vm245_vm2, %v4703_v8  ;;  %4033 = vmatmul.mubr.msk.bf16.vlgmr.msra.gmra.mrb[36].mxu1 %vm245_vm2, %v4705_v9 }
  0x66   : > { %4037 = vmatpush3.bf16.msra.mxu0 %v4672_v49  ;;  %4043 = vmatpush3.bf16.msra.mxu1 %v4672_v49 }
  0x67   : > { %4038 = vmatprep.mubr.msk.bf16.mxu0 %vm4457_vm1, %v4456_v1  ;;  %4044 = vmatprep.mubr.msk.bf16.mxu1 %vm4457_vm1, %v4456_v1 }
  0x68   : > { %4048 = vmatprep.subr.bf16.mxu0 %v4456_v1  ;;  %4054 = vmatprep.subr.bf16.mxu1 %v4456_v1 }
  0x6d   : > { %4039 = vmatmul.mubr.msk.bf16.vlgmr.msra.gmra.mrb[40].mxu0 %vm245_vm2, %v4719_v24  ;;  %4045 = vmatmul.mubr.msk.bf16.vlgmr.msra.gmra.mrb[40].mxu1 %vm245_vm2, %v4721_v25 }
  0x6e   : > { %4049 = vmatpush3.bf16.msra.mxu0 %v4672_v49  ;;  %4055 = vmatpush3.bf16.msra.mxu1 %v4672_v49  ;;  %v4769_v49 = vld [vmem:[%s4546_s30 + $0x150] sm:$0xff] }
  0x6f   : > { %4050 = vmatprep.mubr.msk.bf16.mxu0 %vm4457_vm1, %v4456_v1  ;;  %4056 = vmatprep.mubr.msk.bf16.mxu1 %vm4457_vm1, %v4456_v1  ;;  %v1369_v51 = vpack.c.bf16 %v4769_v49, %v4769_v49 }
  0x70   : > { %4060 = vmatprep.subr.bf16.mxu0 %v4456_v1  ;;  %4066 = vmatprep.subr.bf16.mxu1 %v4456_v1 }
  0x75   : > { %4051 = vmatmul.mubr.msk.bf16.vlgmr.msra.gmra.mrb[44].mxu0 %vm245_vm2, %v4738_v39  ;;  %4057 = vmatmul.mubr.msk.bf16.vlgmr.msra.gmra.mrb[44].mxu1 %vm245_vm2, %v4740_v40 }
  0x76   : > { %4061 = vmatpush3.bf16.msra.mxu0 %v1378_v41  ;;  %4067 = vmatpush3.bf16.msra.mxu1 %v1378_v41 }
  0x77   : > { %4062 = vmatprep.mubr.msk.bf16.mxu0 %vm4457_vm1, %v4456_v1  ;;  %4068 = vmatprep.mubr.msk.bf16.mxu1 %vm4457_vm1, %v4456_v1 }
  0x78   : > { %4072 = vmatprep.subr.bf16.mxu0 %v4456_v1  ;;  %4078 = vmatprep.subr.bf16.mxu1 %v4456_v1 }
  0x7d   : > { %4063 = vmatmul.mubr.msk.bf16.vlgmr.msra.gmra.mrb[48].mxu0 %vm245_vm2, %v1366_v44  ;;  %4069 = vmatmul.mubr.msk.bf16.vlgmr.msra.gmra.mrb[48].mxu1 %vm245_vm2, %v1367_v47  ;;  %v2162_v44 = vshll.u32 %v2099_v31, 16  ;;  %v4871_v47 = vsel %vm249_vm0, %v2097_v36, 0  ;;  %v3738_v36 = vld [vmem:[%s5179_s1 + $0x18] sm:$0xf] }
  0x7e   : > { %4073 = vmatpush3.bf16.msra.mxu0 %v1378_v41  ;;  %4079 = vmatpush3.bf16.msra.mxu1 %v1378_v41 }
  0x7f   : > { %4074 = vmatprep.mubr.msk.bf16.mxu0 %vm4457_vm1, %v4456_v1  ;;  %4080 = vmatprep.mubr.msk.bf16.mxu1 %vm4457_vm1, %v4456_v1  ;;  %v2164_v60 = vrot.slane %v2162_v44, 1 }
  0x80   : > { %4084 = vmatprep.subr.bf16.mxu0 %v4456_v1  ;;  %4090 = vmatprep.subr.bf16.mxu1 %v4456_v1 }
  0x85   : > { %4075 = vmatmul.mubr.msk.bf16.vlgmr.msra.gmra.mrb[52].mxu0 %vm245_vm2, %v1368_v50  ;;  %4081 = vmatmul.mubr.msk.bf16.vlgmr.msra.gmra.mrb[52].mxu1 %vm245_vm2, %v1369_v51  ;;  %v2100_v50 = vpack.c.bf16 %v3666_v37, %v4766_v48  ;;  %v2101_v51 = vpack.c.bf16 %v3668_v38, %v4769_v49  ;;  %v3670_v48 = vld [vmem:[%s4546_s30 + $0x168] sm:$0x1]  ;;  %v3672_v49 = vld [vmem:[%s4546_s30 + $0x178] sm:$0x1] }
  0x86   : > { %4085 = vmatpush3.bf16.msra.mxu0 %v1378_v41  ;;  %4091 = vmatpush3.bf16.msra.mxu1 %v1378_v41  ;;  %v2102_v2 = vpack.c.bf16 %v3670_v48, %v4784_v52  ;;  %v3674_v52 = vld [vmem:[%s4546_s30 + $0x188] sm:$0x1] }
  0x87   : > { %4086 = vmatprep.mubr.msk.bf16.mxu0 %vm4457_vm1, %v4456_v1  ;;  %4092 = vmatprep.mubr.msk.bf16.mxu1 %vm4457_vm1, %v4456_v1  ;;  %v2262_v0 = vshll.u32 %v2101_v51, 16  ;;  %v2260_v6 = vshrl.u32 %v2101_v51, 16 }
  0x88   : > { %4096 = vmatprep.subr.bf16.mxu0 %v4456_v1  ;;  %4102 = vmatprep.subr.bf16.mxu1 %v4456_v1  ;;  %v2312_v17 = vshll.u32 %v2102_v2, 16  ;;  %v2310_v23 = vshrl.u32 %v2102_v2, 16 }
  0x8a   : > { %v2314_v27 = vrot.slane %v2312_v17, 1 }
  0x8d   : > { %4087 = vmatmul.mubr.msk.bf16.vlgmr.msra.gmra.mrb[56].mxu0 %vm245_vm2, %v1370_v54  ;;  %4093 = vmatmul.mubr.msk.bf16.vlgmr.msra.gmra.mrb[56].mxu1 %vm245_vm2, %v1371_v55  ;;  %v2107_v54 = vshrl.u32 %v2098_v28, 16  ;;  %v2111_v55 = vrot.slane %v2109_v43, 1  ;;  %v2519_v43 = vpack.c.bf16 %v3738_v36, %v3738_v36 }
  0x8e   : > { %4097 = vmatpush3.bf16.msra.mxu0 %v1378_v41  ;;  %4103 = vmatpush3.bf16.msra.mxu1 %v1378_v41  ;;  %v1738_v41 = vpack.c.bf16 %v3683_v32, %v3683_v32 }
  0x8f   : > { %4098 = vmatprep.mubr.msk.bf16.mxu0 %vm4457_vm1, %v4456_v1  ;;  %4104 = vmatprep.mubr.msk.bf16.mxu1 %vm4457_vm1, %v4456_v1  ;;  %v2522_v51 = vsel %vm249_vm0, %v2519_v43, 0 }
  0x90   : > { %4108 = vmatprep.subr.bf16.mxu0 %v4456_v1  ;;  %4114 = vmatprep.subr.bf16.mxu1 %v4456_v1 }
  0x95   : > { %4099 = vmatmul.mubr.msk.bf16.vlgmr.msra.gmra.mrb[60].mxu0 %vm245_vm2, %v1372_v61  ;;  %4105 = vmatmul.mubr.msk.bf16.vlgmr.msra.gmra.mrb[60].mxu1 %vm245_vm2, %v1373_v62  ;;  %v2112_v61 = vor.u32 %v2111_v55, %v2107_v54  ;;  %v2165_v62 = vor.u32 %v2164_v60, %v2160_v56 }
  0x96   : > { %4109 = vmatpush3.bf16.msra.mxu0 %v1744_v63  ;;  %4115 = vmatpush3.bf16.msra.mxu1 %v1744_v63 }
  0x97   : > { %4110 = vmatprep.mubr.msk.bf16.mxu0 %vm4457_vm1, %v4456_v1  ;;  %4116 = vmatprep.mubr.msk.bf16.mxu1 %vm4457_vm1, %v4456_v1 }
  0x98   : > { %4120 = vmatprep.subr.bf16.mxu0 %v4456_v1  ;;  %4126 = vmatprep.subr.bf16.mxu1 %v4456_v1 }
  0x9d   : > { %4111 = vmatmul.mubr.msk.bf16.vlgmr.msra.gmra.mrb[64].mxu0 %vm245_vm2, %v1732_v3  ;;  %4117 = vmatmul.mubr.msk.bf16.vlgmr.msra.gmra.mrb[64].mxu1 %vm245_vm2, %v1733_v4  ;;  %v2103_v3 = vpack.c.bf16 %v3672_v49, %v4787_v53  ;;  %v2210_v4 = vshrl.u32 %v2100_v50, 16  ;;  %v3676_v53 = vld [vmem:[%s4546_s30 + $0x198] sm:$0x1] }
  0x9e   : > { %4121 = vmatpush3.bf16.msra.mxu0 %v1744_v63  ;;  %4127 = vmatpush3.bf16.msra.mxu1 %v1744_v63  ;;  %v2105_v22 = vpack.c.bf16 %v3676_v53, %v4808_v58 }
  0x9f   : > { %4122 = vmatprep.mubr.msk.bf16.mxu0 %vm4457_vm1, %v4456_v1  ;;  %4128 = vmatprep.mubr.msk.bf16.mxu1 %vm4457_vm1, %v4456_v1  ;;  %v2360_v28 = vshrl.u32 %v2103_v3, 16 }
  0xa0   : > { %4132 = vmatprep.subr.bf16.mxu0 %v4456_v1  ;;  %4138 = vmatprep.subr.bf16.mxu1 %v4456_v1  ;;  %v2462_v35 = vshll.u32 %v2105_v22, 16 }
  0xa5   : > { %4123 = vmatmul.mubr.msk.bf16.vlgmr.msra.gmra.mrb[68].mxu0 %vm245_vm2, %v1734_v12  ;;  %4129 = vmatmul.mubr.msk.bf16.vlgmr.msra.gmra.mrb[68].mxu1 %vm245_vm2, %v1735_v13  ;;  %v2264_v12 = vrot.slane %v2262_v0, 1 }
  0xa6   : > { %4133 = vmatpush3.bf16.msra.mxu0 %v1744_v63  ;;  %4139 = vmatpush3.bf16.msra.mxu1 %v1744_v63 }
  0xa7   : > { %4134 = vmatprep.mubr.msk.bf16.mxu0 %vm4457_vm1, %v4456_v1  ;;  %4140 = vmatprep.mubr.msk.bf16.mxu1 %vm4457_vm1, %v4456_v1  ;;  %v2265_v16 = vor.u32 %v2264_v12, %v2260_v6 }
  0xa8   : > { %4144 = vmatprep.subr.bf16.mxu0 %v4456_v1  ;;  %4150 = vmatprep.subr.bf16.mxu1 %v4456_v1 }
  0xad   : > { %4135 = vmatmul.mubr.msk.bf16.vlgmr.msra.gmra.mrb[72].mxu0 %vm245_vm2, %v1736_v18  ;;  %4141 = vmatmul.mubr.msk.bf16.vlgmr.msra.gmra.mrb[72].mxu1 %vm245_vm2, %v1737_v19  ;;  %v2362_v18 = vshll.u32 %v2103_v3, 16  ;;  %v2104_v19 = vpack.c.bf16 %v3674_v52, %v4805_v57  ;;  %v2315_v57 = vor.u32 %v2314_v27, %v2310_v23  ;;  %v3756_v27 = vld [vmem:[%s5179_s1 + $0x20] sm:$0xf] }
  0xae   : > { %4145 = vmatpush3.bf16.msra.mxu0 %v1744_v63  ;;  %4151 = vmatpush3.bf16.msra.mxu1 %v1744_v63  ;;  %v2212_v63 = vshll.u32 %v2100_v50, 16 }
  0xaf   : > { %4146 = vmatprep.mubr.msk.bf16.mxu0 %vm4457_vm1, %v4456_v1  ;;  %4152 = vmatprep.mubr.msk.bf16.mxu1 %vm4457_vm1, %v4456_v1  ;;  %v2364_v31 = vrot.slane %v2362_v18, 1  ;;  %v2412_v32 = vshll.u32 %v2104_v19, 16  ;;  %v2410_v37 = vshrl.u32 %v2104_v19, 16 }
  0xb0   : > { %4156 = vmatprep.subr.bf16.mxu0 %v4456_v1  ;;  %4162 = vmatprep.subr.bf16.mxu1 %v4456_v1  ;;  %v2214_v5 = vrot.slane %v2212_v63, 1 }
  0xb1   : > { %v2365_v58 = vor.u32 %v2364_v31, %v2360_v28  ;;  %v2414_v38 = vrot.slane %v2412_v32, 1  ;;  %v3660_v28 = vld [vmem:[%s4546_s30 + $0x110] sm:$0xff]  ;;  %v3195_v31 = vpack.c.bf16 %v3756_v27, %v3756_v27 }
  0xb2   : > { %v2215_v13 = vor.u32 %v2214_v5, %v2210_v4  ;;  %v2858_v36 = vpack.c.bf16 %v3660_v28, %v3660_v28 }
  0xb3   : > { %v2415_v44 = vor.u32 %v2414_v38, %v2410_v37  ;;  %v3198_v43 = vsel %vm249_vm0, %v3195_v31, 0 }
  0xb5   : > { %4147 = vmatmul.mubr.msk.bf16.vlgmr.msra.gmra.mrb[76].mxu0 %vm245_vm2, %v1738_v41  ;;  %4153 = vmatmul.mubr.msk.bf16.vlgmr.msra.gmra.mrb[76].mxu1 %vm245_vm2, %v1739_v42  ;;  %v2460_v41 = vshrl.u32 %v2105_v22, 16  ;;  %v2464_v42 = vrot.slane %v2462_v35, 1 }
  0xb6   : > { %4157 = vmatpush3.bf16.msra.mxu0 %v4871_v47  ;;  %4163 = vmatpush3.bf16.msra.mxu1 %v4871_v47 }
  0xb7   : > { %4158 = vmatprep.mubr.msk.bf16.mxu0 %vm4457_vm1, %v4456_v1  ;;  %4164 = vmatprep.mubr.msk.bf16.mxu1 %vm4457_vm1, %v4456_v1  ;;  %v2465_v50 = vor.u32 %v2464_v42, %v2460_v41 }
  0xb8   : > { %4168 = vmatprep.subr.bf16.mxu0 %v4456_v1  ;;  %4174 = vmatprep.subr.bf16.mxu1 %v4456_v1 }
  0xbd   : > { %4159 = vmatmul.mubr.msk.bf16.vlgmr.msra.gmra.mrb[80].mxu0 %vm245_vm2, %v2112_v61  ;;  %4165 = vmatmul.mubr.msk.bf16.vlgmr.msra.gmra.mrb[80].mxu1 %vm245_vm2, %v2165_v62 }
  0xbe   : > { %4169 = vmatpush3.bf16.msra.mxu0 %v4871_v47  ;;  %4175 = vmatpush3.bf16.msra.mxu1 %v4871_v47 }
  0xbf   : > { %4170 = vmatprep.mubr.msk.bf16.mxu0 %vm4457_vm1, %v4456_v1  ;;  %4176 = vmatprep.mubr.msk.bf16.mxu1 %vm4457_vm1, %v4456_v1 }
  0xc0   : > { %4180 = vmatprep.subr.bf16.mxu0 %v4456_v1  ;;  %4186 = vmatprep.subr.bf16.mxu1 %v4456_v1 }
  0xc5   : > { %4171 = vmatmul.mubr.msk.bf16.vlgmr.msra.gmra.mrb[84].mxu0 %vm245_vm2, %v2215_v13  ;;  %4177 = vmatmul.mubr.msk.bf16.vlgmr.msra.gmra.mrb[84].mxu1 %vm245_vm2, %v2265_v16 }
  0xc6   : > { %4181 = vmatpush3.bf16.msra.mxu0 %v4871_v47  ;;  %4187 = vmatpush3.bf16.msra.mxu1 %v4871_v47 }
  0xc7   : > { %4182 = vmatprep.mubr.msk.bf16.mxu0 %vm4457_vm1, %v4456_v1  ;;  %4188 = vmatprep.mubr.msk.bf16.mxu1 %vm4457_vm1, %v4456_v1 }
  0xc8   : > { %4192 = vmatprep.subr.bf16.mxu0 %v4456_v1  ;;  %4198 = vmatprep.subr.bf16.mxu1 %v4456_v1 }
  0xcd   : > { %4183 = vmatmul.mubr.msk.bf16.vlgmr.msra.gmra.mrb[88].mxu0 %vm245_vm2, %v2315_v57  ;;  %4189 = vmatmul.mubr.msk.bf16.vlgmr.msra.gmra.mrb[88].mxu1 %vm245_vm2, %v2365_v58 }
  0xce   : > { %4193 = vmatpush3.bf16.msra.mxu0 %v4871_v47  ;;  %4199 = vmatpush3.bf16.msra.mxu1 %v4871_v47 }
  0xcf   : > { %4194 = vmatprep.mubr.msk.bf16.mxu0 %vm4457_vm1, %v4456_v1  ;;  %4200 = vmatprep.mubr.msk.bf16.mxu1 %vm4457_vm1, %v4456_v1 }
  0xd0   : > { %4204 = vmatprep.subr.bf16.mxu0 %v4456_v1  ;;  %4210 = vmatprep.subr.bf16.mxu1 %v4456_v1 }
  0xd5   : > { %4195 = vmatmul.mubr.msk.bf16.vlgmr.msra.gmra.mrb[92].mxu0 %vm245_vm2, %v2415_v44  ;;  %4201 = vmatmul.mubr.msk.bf16.vlgmr.msra.gmra.mrb[92].mxu1 %vm245_vm2, %v2465_v50 }
  0xd6   : > { %4205 = vmatpush3.bf16.msra.mxu0 %v2522_v51  ;;  %4211 = vmatpush3.bf16.msra.mxu1 %v2522_v51 }
  0xd7   : > { %4206 = vmatprep.mubr.msk.bf16.mxu0 %vm4457_vm1, %v4456_v1  ;;  %4212 = vmatprep.mubr.msk.bf16.mxu1 %vm4457_vm1, %v4456_v1 }
  0xd8   : > { %4216 = vmatprep.subr.bf16.mxu0 %v4456_v1  ;;  %4222 = vmatprep.subr.bf16.mxu1 %v4456_v1 }
  0xdd   : > { %4207 = vmatmul.mubr.msk.bf16.vlgmr.msra.gmra.mrb[96].mxu0 %vm245_vm2, %v4615_v26  ;;  %4213 = vmatmul.mubr.msk.bf16.vlgmr.msra.gmra.mrb[96].mxu1 %vm245_vm2, %v4628_v29  ;;  %v3747_v26 = vld [vmem:[%s5179_s1 + $0x1c] sm:$0xf]  ;;  %v4963_v29 = vld [vmem:[%s4546_s30 + $0x80] sm:$0xff] }
  0xde   : > { %4217 = vmatpush3.bf16.msra.mxu0 %v2522_v51  ;;  %4223 = vmatpush3.bf16.msra.mxu1 %v2522_v51  ;;  %v2520_v54 = vpack.c.bf16 %v4963_v29, %v4963_v29 }
  0xdf   : > { %4218 = vmatprep.mubr.msk.bf16.mxu0 %vm4457_vm1, %v4456_v1  ;;  %4224 = vmatprep.mubr.msk.bf16.mxu1 %vm4457_vm1, %v4456_v1 }
  0xe0   : > { %4228 = vmatprep.subr.bf16.mxu0 %v4456_v1  ;;  %4234 = vmatprep.subr.bf16.mxu1 %v4456_v1 }
  0xe5   : > { %4219 = vmatmul.mubr.msk.bf16.vlgmr.msra.gmra.mrb[100].mxu0 %vm245_vm2, %v4630_v30  ;;  %4225 = vmatmul.mubr.msk.bf16.vlgmr.msra.gmra.mrb[100].mxu1 %vm245_vm2, %v4644_v33  ;;  %v2857_v30 = vpack.c.bf16 %v3747_v26, %v3747_v26 }
  0xe6   : > { %4229 = vmatpush3.bf16.msra.mxu0 %v2522_v51  ;;  %4235 = vmatpush3.bf16.msra.mxu1 %v2522_v51 }
  0xe7   : > { %4230 = vmatprep.mubr.msk.bf16.mxu0 %vm4457_vm1, %v4456_v1  ;;  %4236 = vmatprep.mubr.msk.bf16.mxu1 %vm4457_vm1, %v4456_v1  ;;  %v2860_v49 = vsel %vm249_vm0, %v2857_v30, 0 }
  0xe8   : > { %4240 = vmatprep.subr.bf16.mxu0 %v4456_v1  ;;  %4246 = vmatprep.subr.bf16.mxu1 %v4456_v1 }
  0xed   : > { %4231 = vmatmul.mubr.msk.bf16.vlgmr.msra.gmra.mrb[104].mxu0 %vm245_vm2, %v4646_v34  ;;  %4237 = vmatmul.mubr.msk.bf16.vlgmr.msra.gmra.mrb[104].mxu1 %vm245_vm2, %v4667_v45 }
  0xee   : > { %4241 = vmatpush3.bf16.msra.mxu0 %v2522_v51  ;;  %4247 = vmatpush3.bf16.msra.mxu1 %v2522_v51 }
  0xef   : > { %4242 = vmatprep.mubr.msk.bf16.mxu0 %vm4457_vm1, %v4456_v1  ;;  %4248 = vmatprep.mubr.msk.bf16.mxu1 %vm4457_vm1, %v4456_v1 }
  0xf0   : > { %v4969_v33 = vpop.f32.mrb[0].mxu0  ;;  %v4971_v47 = vpop.f32.mrb[0].mxu1  ;;  %4252 = vmatprep.subr.bf16.mxu0 %v4456_v1  ;;  %4258 = vmatprep.subr.bf16.mxu1 %v4456_v1 }
  0xf1   : > { %v3920_v34 = vpop.f32.mrb[1].mxu0  ;;  %v3926_v45 = vpop.f32.mrb[1].mxu1 }
  0xf2   : > { %v290_v55 = vpop.f32.mrb[2].mxu0  ;;  %v333_v56 = vpop.f32.mrb[2].mxu1 }
  0xf3   : > { %v3921_v60 = vpop.f32.mrb[3].mxu0  ;;  %v3927_v48 = vpop.f32.mrb[3].mxu1 }
  0xf4   : > { %v187_v48 = vld [vmem:[%s4546_s30 + $0x88] sm:$0x1] }
  0xf5   : > { %4243 = vmatmul.mubr.msk.bf16.vlgmr.msra.gmra.mrb[108].mxu0 %vm245_vm2, %v4669_v46  ;;  %4249 = vmatmul.mubr.msk.bf16.vlgmr.msra.gmra.mrb[108].mxu1 %vm245_vm2, %v2520_v54 }
  0xf6   : > { %4253 = vmatpush3.bf16.msra.mxu0 %v2860_v49  ;;  %4259 = vmatpush3.bf16.msra.mxu1 %v2860_v49 }
  0xf7   : > { %4254 = vmatprep.mubr.msk.bf16.mxu0 %vm4457_vm1, %v4456_v1  ;;  %4260 = vmatprep.mubr.msk.bf16.mxu1 %vm4457_vm1, %v4456_v1 }
  0xf8   : > { %v4985_v61 = vpop.f32.mrb[4].mxu0  ;;  %v4987_v62 = vpop.f32.mrb[4].mxu1  ;;  %4264 = vmatprep.subr.bf16.mxu0 %v4456_v1  ;;  %4270 = vmatprep.subr.bf16.mxu1 %v4456_v1 }
  0xf9   : > { %v3932_v63 = vpop.f32.mrb[5].mxu0  ;;  %v3938_v46 = vpop.f32.mrb[5].mxu1 }
  0xfa   : > { %v376_v0 = vpop.f32.mrb[6].mxu0  ;;  %v419_v2 = vpop.f32.mrb[6].mxu1  ;;  %v3196_v46 = vpack.c.bf16 %v187_v48, %v4963_v29 }
  0xfb   : > { %v3933_v3 = vpop.f32.mrb[7].mxu0  ;;  %v3939_v4 = vpop.f32.mrb[7].mxu1 }
  0xfc   : > { %v3483_v4 = vshll.u32 %v3196_v46, 16 }
  0xfd   : > { %4255 = vmatmul.mubr.msk.bf16.vlgmr.msra.gmra.mrb[112].mxu0 %vm245_vm2, %v4550_v7  ;;  %4261 = vmatmul.mubr.msk.bf16.vlgmr.msra.gmra.mrb[112].mxu1 %vm245_vm2, %v4563_v10 }
  0xfe   : > { %4265 = vmatpush3.bf16.msra.mxu0 %v2860_v49  ;;  %4271 = vmatpush3.bf16.msra.mxu1 %v2860_v49 }
  0xff   : > { %4266 = vmatprep.mubr.msk.bf16.mxu0 %vm4457_vm1, %v4456_v1  ;;  %4272 = vmatprep.mubr.msk.bf16.mxu1 %vm4457_vm1, %v4456_v1 }
 0x100   : > { %v4999_v5 = vpop.f32.mrb[8].mxu0  ;;  %v5001_v6 = vpop.f32.mrb[8].mxu1  ;;  %4276 = vmatprep.subr.bf16.mxu0 %v4456_v1  ;;  %4282 = vmatprep.subr.bf16.mxu1 %v4456_v1 }
 0x101   : > { %v3944_v7 = vpop.f32.mrb[9].mxu0  ;;  %v3950_v12 = vpop.f32.mrb[9].mxu1 }
 0x102   : > { %v462_v52 = vpop.f32.mrb[10].mxu0  ;;  %v505_v10 = vpop.f32.mrb[10].mxu1 }
 0x103   : > { %v3945_v53 = vpop.f32.mrb[11].mxu0  ;;  %v3951_v13 = vpop.f32.mrb[11].mxu1  ;;  %v3481_v52 = vshrl.u32 %v3196_v46, 16  ;;  %v3485_v10 = vrot.slane %v3483_v4, 1 }
 0x105   : > { %4267 = vmatmul.mubr.msk.bf16.vlgmr.msra.gmra.mrb[116].mxu0 %vm245_vm2, %v4565_v11  ;;  %4273 = vmatmul.mubr.msk.bf16.vlgmr.msra.gmra.mrb[116].mxu1 %vm245_vm2, %v4579_v14 }
 0x106   : > { %4277 = vmatpush3.bf16.msra.mxu0 %v2860_v49  ;;  %4283 = vmatpush3.bf16.msra.mxu1 %v2860_v49 }
 0x107   : > { %4278 = vmatprep.mubr.msk.bf16.mxu0 %vm4457_vm1, %v4456_v1  ;;  %4284 = vmatprep.mubr.msk.bf16.mxu1 %vm4457_vm1, %v4456_v1 }
 0x108   : > { %v5013_v16 = vpop.f32.mrb[12].mxu0  ;;  %v5015_v17 = vpop.f32.mrb[12].mxu1  ;;  %4288 = vmatprep.subr.bf16.mxu0 %v4456_v1  ;;  %4294 = vmatprep.subr.bf16.mxu1 %v4456_v1 }
 0x109   : > { %v3956_v11 = vpop.f32.mrb[13].mxu0  ;;  %v3962_v18 = vpop.f32.mrb[13].mxu1 }
 0x10a   : > { %v548_v14 = vpop.f32.mrb[14].mxu0  ;;  %v591_v19 = vpop.f32.mrb[14].mxu1  ;;  %v3486_v18 = vor.u32 %v3485_v10, %v3481_v52 }
 0x10b   : > { %v3957_v22 = vpop.f32.mrb[15].mxu0  ;;  %v3963_v23 = vpop.f32.mrb[15].mxu1 }
 0x10d   : > { %4279 = vmatmul.mubr.msk.bf16.vlgmr.msra.gmra.mrb[120].mxu0 %vm245_vm2, %v4581_v15  ;;  %4285 = vmatmul.mubr.msk.bf16.vlgmr.msra.gmra.mrb[120].mxu1 %vm245_vm2, %v4598_v20 }
 0x10e   : > { %4289 = vmatpush3.bf16.msra.mxu0 %v2860_v49  ;;  %4295 = vmatpush3.bf16.msra.mxu1 %v2860_v49 }
 0x10f   : > { %4290 = vmatprep.mubr.msk.bf16.mxu0 %vm4457_vm1, %v4456_v1  ;;  %4296 = vmatprep.mubr.msk.bf16.mxu1 %vm4457_vm1, %v4456_v1 }
 0x110   : > { %v634_v57 = vpop.f32.mrb[16].mxu0  ;;  %v677_v58 = vpop.f32.mrb[16].mxu1  ;;  %4300 = vmatprep.subr.bf16.mxu0 %v4456_v1  ;;  %4306 = vmatprep.subr.bf16.mxu1 %v4456_v1 }
 0x111   : > { %v5034_v15 = vadd.f32 %v634_v57, %v4969_v33  ;;  %v5037_v20 = vadd.f32 %v677_v58, %v4971_v47  ;;  %v3968_v32 = vpop.f32.mrb[17].mxu0  ;;  %v3974_v35 = vpop.f32.mrb[17].mxu1 }
 0x112   : > { %v637_v37 = vpop.f32.mrb[18].mxu0  ;;  %v680_v38 = vpop.f32.mrb[18].mxu1 }
 0x113   : > { %v3969_v41 = vpop.f32.mrb[19].mxu0  ;;  %v3975_v42 = vpop.f32.mrb[19].mxu1 }
 0x115   : > { %4291 = vmatmul.mubr.msk.bf16.vlgmr.msra.gmra.mrb[124].mxu0 %vm245_vm2, %v4600_v21  ;;  %4297 = vmatmul.mubr.msk.bf16.vlgmr.msra.gmra.mrb[124].mxu1 %vm245_vm2, %v2858_v36 }
 0x116   : > { %4301 = vmatpush3.bf16.msra.mxu0 %v3198_v43  ;;  %4307 = vmatpush3.bf16.msra.mxu1 %v3198_v43 }
 0x117   : > { %4302 = vmatprep.mubr.msk.bf16.mxu0 %vm4457_vm1, %v4456_v1  ;;  %4308 = vmatprep.mubr.msk.bf16.mxu1 %vm4457_vm1, %v4456_v1 }
 0x118   : > { %v720_v44 = vpop.f32.mrb[20].mxu0  ;;  %v763_v50 = vpop.f32.mrb[20].mxu1  ;;  %4312 = vmatprep.subr.bf16.mxu0 %v4456_v1  ;;  %4318 = vmatprep.subr.bf16.mxu1 %v4456_v1 }
 0x119   : > { %v5050_v51 = vadd.f32 %v720_v44, %v4985_v61  ;;  %v5053_v21 = vadd.f32 %v763_v50, %v4987_v62  ;;  %v3980_v26 = vpop.f32.mrb[21].mxu0  ;;  %v3986_v30 = vpop.f32.mrb[21].mxu1 }
 0x11a   : > { %v723_v33 = vpop.f32.mrb[22].mxu0  ;;  %v766_v47 = vpop.f32.mrb[22].mxu1 }
 0x11b   : > { %v3981_v34 = vpop.f32.mrb[23].mxu0  ;;  %v3987_v45 = vpop.f32.mrb[23].mxu1 }
 0x11d   : > { %4303 = vmatmul.mubr.msk.bf16.vlgmr.msra.gmra.mrb[128].mxu0 %vm245_vm2, %v4688_v59  ;;  %4309 = vmatmul.mubr.msk.bf16.vlgmr.msra.gmra.mrb[128].mxu1 %vm245_vm2, %v4703_v8 }
 0x11e   : > { %4313 = vmatpush3.bf16.msra.mxu0 %v3198_v43  ;;  %4319 = vmatpush3.bf16.msra.mxu1 %v3198_v43 }
 0x11f   : > { %4314 = vmatprep.mubr.msk.bf16.mxu0 %vm4457_vm1, %v4456_v1  ;;  %4320 = vmatprep.mubr.msk.bf16.mxu1 %vm4457_vm1, %v4456_v1 }
 0x120   : > { %v806_v54 = vpop.f32.mrb[24].mxu0  ;;  %v849_v55 = vpop.f32.mrb[24].mxu1  ;;  %4324 = vmatprep.subr.bf16.mxu0 %v4456_v1  ;;  %4330 = vmatprep.subr.bf16.mxu1 %v4456_v1 }
 0x121   : > { %v807_v56 = vadd.f32 %v806_v54, %v4999_v5  ;;  %v850_v59 = vadd.f32 %v849_v55, %v5001_v6  ;;  %v3992_v60 = vpop.f32.mrb[25].mxu0  ;;  %v3998_v8 = vpop.f32.mrb[25].mxu1 }
 0x122   : > { %v809_v49 = vpop.f32.mrb[26].mxu0  ;;  %v852_v61 = vpop.f32.mrb[26].mxu1 }
 0x123   : > { %v3993_v62 = vpop.f32.mrb[27].mxu0  ;;  %v3999_v63 = vpop.f32.mrb[27].mxu1 }
 0x125   : > { %4315 = vmatmul.mubr.msk.bf16.vlgmr.msra.gmra.mrb[132].mxu0 %vm245_vm2, %v4705_v9  ;;  %4321 = vmatmul.mubr.msk.bf16.vlgmr.msra.gmra.mrb[132].mxu1 %vm245_vm2, %v4719_v24 }
 0x126   : > { %4325 = vmatpush3.bf16.msra.mxu0 %v3198_v43  ;;  %4331 = vmatpush3.bf16.msra.mxu1 %v3198_v43 }
 0x127   : > { %4326 = vmatprep.mubr.msk.bf16.mxu0 %vm4457_vm1, %v4456_v1  ;;  %4332 = vmatprep.mubr.msk.bf16.mxu1 %vm4457_vm1, %v4456_v1 }
 0x128   : > { %v892_v0 = vpop.f32.mrb[28].mxu0  ;;  %v935_v2 = vpop.f32.mrb[28].mxu1  ;;  %4336 = vmatprep.subr.bf16.mxu0 %v4456_v1  ;;  %4342 = vmatprep.subr.bf16.mxu1 %v4456_v1 }
 0x129   : > { %v893_v29 = vadd.f32 %v892_v0, %v5013_v16  ;;  %v936_v9 = vadd.f32 %v935_v2, %v5015_v17  ;;  %v4004_v3 = vpop.f32.mrb[29].mxu0  ;;  %v4010_v24 = vpop.f32.mrb[29].mxu1 }
 0x12a   : > { %v895_v5 = vpop.f32.mrb[30].mxu0  ;;  %v938_v6 = vpop.f32.mrb[30].mxu1 }
 0x12b   : > { %v4005_v7 = vpop.f32.mrb[31].mxu0  ;;  %v4011_v12 = vpop.f32.mrb[31].mxu1 }
 0x12d   : > { %4327 = vmatmul.mubr.msk.bf16.vlgmr.msra.gmra.mrb[136].mxu0 %vm245_vm2, %v4721_v25  ;;  %4333 = vmatmul.mubr.msk.bf16.vlgmr.msra.gmra.mrb[136].mxu1 %vm245_vm2, %v4738_v39 }
 0x12e   : > { %4337 = vmatpush3.bf16.msra.mxu0 %v3198_v43  ;;  %4343 = vmatpush3.bf16.msra.mxu1 %v3198_v43 }
 0x12f   : > { %4338 = vmatprep.mubr.msk.bf16.mxu0 %vm4457_vm1, %v4456_v1  ;;  %4344 = vmatprep.mubr.msk.bf16.mxu1 %vm4457_vm1, %v4456_v1 }
 0x130   : > { %v999_v53 = vpop.f32.mrb[32].mxu0  ;;  %v1049_v13 = vpop.f32.mrb[32].mxu1 }
 0x131   : > { %v1355_v16 = vadd.f32 %v999_v53, %v5034_v15  ;;  %v1356_v17 = vadd.f32 %v1049_v13, %v5037_v20  ;;  %v4016_v25 = vpop.f32.mrb[33].mxu0  ;;  %v4022_v11 = vpop.f32.mrb[33].mxu1 }
 0x132   : > { %v1002_v39 = vpop.f32.mrb[34].mxu0  ;;  %v1052_v14 = vpop.f32.mrb[34].mxu1 }
 0x133   : > { %v4017_v19 = vpop.f32.mrb[35].mxu0  ;;  %v4023_v22 = vpop.f32.mrb[35].mxu1 }
 0x135   : > { %4339 = vmatmul.mubr.msk.bf16.vlgmr.msra.gmra.mrb[140].mxu0 %vm245_vm2, %v4740_v40  ;;  %4345 = vmatmul.mubr.msk.bf16.vlgmr.msra.gmra.mrb[140].mxu1 %vm245_vm2, %v3486_v18 }
 0x138   : > { %v1099_v23 = vpop.f32.mrb[36].mxu0  ;;  %v1149_v1 = vpop.f32.mrb[36].mxu1 }
 0x139   : > { %v1357_v27 = vadd.f32 %v1099_v23, %v5050_v51  ;;  %v1358_v28 = vadd.f32 %v1149_v1, %v5053_v21  ;;  %v4028_v31 = vpop.f32.mrb[37].mxu0  ;;  %v4034_v57 = vpop.f32.mrb[37].mxu1 }
 0x13a   : > { %v1102_v58 = vpop.f32.mrb[38].mxu0  ;;  %v1152_v15 = vpop.f32.mrb[38].mxu1 }
 0x13b   : > { %v4029_v20 = vpop.f32.mrb[39].mxu0  ;;  %v4035_v32 = vpop.f32.mrb[39].mxu1 }
 0x140   : > { %v1199_v35 = vpop.f32.mrb[40].mxu0  ;;  %v1249_v36 = vpop.f32.mrb[40].mxu1 }
 0x141   : > { %v1359_v37 = vadd.f32 %v1199_v35, %v807_v56  ;;  %v1360_v38 = vadd.f32 %v1249_v36, %v850_v59  ;;  %v4040_v41 = vpop.f32.mrb[41].mxu0  ;;  %v4046_v40 = vpop.f32.mrb[41].mxu1 }
 0x142   : > { %v1202_v42 = vpop.f32.mrb[42].mxu0  ;;  %v1252_v43 = vpop.f32.mrb[42].mxu1 }
 0x143   : > { %v4041_v44 = vpop.f32.mrb[43].mxu0  ;;  %v4047_v50 = vpop.f32.mrb[43].mxu1 }
 0x148   : > { %v1299_v26 = vpop.f32.mrb[44].mxu0  ;;  %v1349_v51 = vpop.f32.mrb[44].mxu1 }
 0x149   : > { %v1361_v30 = vadd.f32 %v1299_v26, %v893_v29  ;;  %v1362_v21 = vadd.f32 %v1349_v51, %v936_v9  ;;  %v4052_v33 = vpop.f32.mrb[45].mxu0  ;;  %v4058_v47 = vpop.f32.mrb[45].mxu1 }
 0x14a   : > { %v1302_v34 = vpop.f32.mrb[46].mxu0  ;;  %v1352_v45 = vpop.f32.mrb[46].mxu1 }
 0x14b   : > { %v4053_v54 = vpop.f32.mrb[47].mxu0  ;;  %v4059_v55 = vpop.f32.mrb[47].mxu1 }
 0x150   : > { %v1414_v60 = vpop.f32.mrb[48].mxu0  ;;  %v1457_v8 = vpop.f32.mrb[48].mxu1 }
 0x151   : > { %v1721_v56 = vadd.f32 %v1414_v60, %v1355_v16  ;;  %v1722_v59 = vadd.f32 %v1457_v8, %v1356_v17  ;;  %v4064_v48 = vpop.f32.mrb[49].mxu0  ;;  %v4070_v49 = vpop.f32.mrb[49].mxu1 }
 0x152   : > { %v1417_v61 = vpop.f32.mrb[50].mxu0  ;;  %v1460_v62 = vpop.f32.mrb[50].mxu1 }
 0x153   : > { %v4065_v63 = vpop.f32.mrb[51].mxu0  ;;  %v4071_v46 = vpop.f32.mrb[51].mxu1 }
 0x158   : > { %v1500_v0 = vpop.f32.mrb[52].mxu0  ;;  %v1543_v2 = vpop.f32.mrb[52].mxu1 }
 0x159   : > { %v1723_v29 = vadd.f32 %v1500_v0, %v1357_v27  ;;  %v1724_v9 = vadd.f32 %v1543_v2, %v1358_v28  ;;  %v4076_v3 = vpop.f32.mrb[53].mxu0  ;;  %v4082_v24 = vpop.f32.mrb[53].mxu1 }
 0x15a   : > { %v1503_v4 = vpop.f32.mrb[54].mxu0  ;;  %v1546_v5 = vpop.f32.mrb[54].mxu1 }
 0x15b   : > { %v4077_v6 = vpop.f32.mrb[55].mxu0  ;;  %v4083_v7 = vpop.f32.mrb[55].mxu1 }
 0x160   : > { %v1586_v12 = vpop.f32.mrb[56].mxu0  ;;  %v1629_v52 = vpop.f32.mrb[56].mxu1 }
 0x161   : > { %v1725_v10 = vadd.f32 %v1586_v12, %v1359_v37  ;;  %v1726_v53 = vadd.f32 %v1629_v52, %v1360_v38  ;;  %v4088_v13 = vpop.f32.mrb[57].mxu0  ;;  %v4094_v16 = vpop.f32.mrb[57].mxu1 }
 0x162   : > { %v1589_v17 = vpop.f32.mrb[58].mxu0  ;;  %v1632_v25 = vpop.f32.mrb[58].mxu1 }
 0x163   : > { %v4089_v11 = vpop.f32.mrb[59].mxu0  ;;  %v4095_v18 = vpop.f32.mrb[59].mxu1 }
 0x168   : > { %v1672_v39 = vpop.f32.mrb[60].mxu0  ;;  %v1715_v14 = vpop.f32.mrb[60].mxu1 }
 0x169   : > { %v1727_v19 = vadd.f32 %v1672_v39, %v1361_v30  ;;  %v1728_v22 = vadd.f32 %v1715_v14, %v1362_v21  ;;  %v4100_v23 = vpop.f32.mrb[61].mxu0  ;;  %v4106_v1 = vpop.f32.mrb[61].mxu1 }
 0x16a   : > { %v1675_v27 = vpop.f32.mrb[62].mxu0  ;;  %v1718_v28 = vpop.f32.mrb[62].mxu1 }
 0x16b   : > { %v4101_v31 = vpop.f32.mrb[63].mxu0  ;;  %v4107_v57 = vpop.f32.mrb[63].mxu1 }
 0x170   : > { %v1780_v58 = vpop.f32.mrb[64].mxu0  ;;  %v1823_v15 = vpop.f32.mrb[64].mxu1 }
 0x171   : > { %v2087_v20 = vadd.f32 %v1780_v58, %v1721_v56  ;;  %v2088_v32 = vadd.f32 %v1823_v15, %v1722_v59  ;;  %v4112_v35 = vpop.f32.mrb[65].mxu0  ;;  %v4118_v36 = vpop.f32.mrb[65].mxu1 }
 0x172   : > { %v1783_v37 = vpop.f32.mrb[66].mxu0  ;;  %v1826_v38 = vpop.f32.mrb[66].mxu1 }
 0x173   : > { %v4113_v41 = vpop.f32.mrb[67].mxu0  ;;  %v4119_v40 = vpop.f32.mrb[67].mxu1 }
 0x178   : > { %v1866_v42 = vpop.f32.mrb[68].mxu0  ;;  %v1909_v43 = vpop.f32.mrb[68].mxu1 }
 0x179   : > { %v2089_v44 = vadd.f32 %v1866_v42, %v1723_v29  ;;  %v2090_v50 = vadd.f32 %v1909_v43, %v1724_v9  ;;  %v4124_v26 = vpop.f32.mrb[69].mxu0  ;;  %v4130_v51 = vpop.f32.mrb[69].mxu1 }
 0x17a   : > { %v1869_v30 = vpop.f32.mrb[70].mxu0  ;;  %v1912_v21 = vpop.f32.mrb[70].mxu1 }
 0x17b   : > { %v4125_v33 = vpop.f32.mrb[71].mxu0  ;;  %v4131_v47 = vpop.f32.mrb[71].mxu1 }
 0x180   : > { %v1952_v34 = vpop.f32.mrb[72].mxu0  ;;  %v1995_v45 = vpop.f32.mrb[72].mxu1 }
 0x181   : > { %v2091_v54 = vadd.f32 %v1952_v34, %v1725_v10  ;;  %v2092_v55 = vadd.f32 %v1995_v45, %v1726_v53  ;;  %v4136_v60 = vpop.f32.mrb[73].mxu0  ;;  %v4142_v8 = vpop.f32.mrb[73].mxu1 }
 0x182   : > { %v1955_v56 = vpop.f32.mrb[74].mxu0  ;;  %v1998_v59 = vpop.f32.mrb[74].mxu1 }
 0x183   : > { %v4137_v48 = vpop.f32.mrb[75].mxu0  ;;  %v4143_v49 = vpop.f32.mrb[75].mxu1 }
 0x188   : > { %v2038_v61 = vpop.f32.mrb[76].mxu0  ;;  %v2081_v62 = vpop.f32.mrb[76].mxu1 }
 0x189   : > { %v2093_v63 = vadd.f32 %v2038_v61, %v1727_v19  ;;  %v2094_v46 = vadd.f32 %v2081_v62, %v1728_v22  ;;  %v4148_v0 = vpop.f32.mrb[77].mxu0  ;;  %v4154_v2 = vpop.f32.mrb[77].mxu1 }
 0x18a   : > { %v2041_v29 = vpop.f32.mrb[78].mxu0  ;;  %v2084_v9 = vpop.f32.mrb[78].mxu1 }
 0x18b   : > { %v4149_v3 = vpop.f32.mrb[79].mxu0  ;;  %v4155_v24 = vpop.f32.mrb[79].mxu1 }
 0x190   : > { %v2153_v4 = vpop.f32.mrb[80].mxu0  ;;  %v2203_v5 = vpop.f32.mrb[80].mxu1 }
 0x191   : > { %v2509_v6 = vadd.f32 %v2153_v4, %v2087_v20  ;;  %v2510_v7 = vadd.f32 %v2203_v5, %v2088_v32  ;;  %v4160_v12 = vpop.f32.mrb[81].mxu0  ;;  %v4166_v52 = vpop.f32.mrb[81].mxu1 }
 0x192   : > { %v2156_v10 = vpop.f32.mrb[82].mxu0  ;;  %v2206_v53 = vpop.f32.mrb[82].mxu1 }
 0x193   : > { %v4161_v13 = vpop.f32.mrb[83].mxu0  ;;  %v4167_v16 = vpop.f32.mrb[83].mxu1 }
 0x198   : > { %v2253_v17 = vpop.f32.mrb[84].mxu0  ;;  %v2303_v25 = vpop.f32.mrb[84].mxu1 }
 0x199   : > { %v2511_v11 = vadd.f32 %v2253_v17, %v2089_v44  ;;  %v2512_v18 = vadd.f32 %v2303_v25, %v2090_v50  ;;  %v4172_v39 = vpop.f32.mrb[85].mxu0  ;;  %v4178_v14 = vpop.f32.mrb[85].mxu1 }
 0x19a   : > { %v2256_v19 = vpop.f32.mrb[86].mxu0  ;;  %v2306_v22 = vpop.f32.mrb[86].mxu1 }
 0x19b   : > { %v4173_v23 = vpop.f32.mrb[87].mxu0  ;;  %v4179_v1 = vpop.f32.mrb[87].mxu1 }
 0x1a0   : > { %v2353_v27 = vpop.f32.mrb[88].mxu0  ;;  %v2403_v28 = vpop.f32.mrb[88].mxu1 }
 0x1a1   : > { %v2513_v31 = vadd.f32 %v2353_v27, %v2091_v54  ;;  %v2514_v57 = vadd.f32 %v2403_v28, %v2092_v55  ;;  %v4184_v58 = vpop.f32.mrb[89].mxu0  ;;  %v4190_v15 = vpop.f32.mrb[89].mxu1 }
 0x1a2   : > { %v2356_v20 = vpop.f32.mrb[90].mxu0  ;;  %v2406_v32 = vpop.f32.mrb[90].mxu1 }
 0x1a3   : > { %v4185_v35 = vpop.f32.mrb[91].mxu0  ;;  %v4191_v36 = vpop.f32.mrb[91].mxu1 }
 0x1a8   : > { %v2453_v37 = vpop.f32.mrb[92].mxu0  ;;  %v2503_v38 = vpop.f32.mrb[92].mxu1 }
 0x1a9   : > { %v2515_v41 = vadd.f32 %v2453_v37, %v2093_v63  ;;  %v2516_v40 = vadd.f32 %v2503_v38, %v2094_v46  ;;  %v4196_v42 = vpop.f32.mrb[93].mxu0  ;;  %v4202_v43 = vpop.f32.mrb[93].mxu1 }
 0x1aa   : > { %v2456_v44 = vpop.f32.mrb[94].mxu0  ;;  %v2506_v50 = vpop.f32.mrb[94].mxu1 }
 0x1ab   : > { %v4197_v26 = vpop.f32.mrb[95].mxu0  ;;  %v4203_v51 = vpop.f32.mrb[95].mxu1 }
 0x1b0   : > { %v2558_v30 = vpop.f32.mrb[96].mxu0  ;;  %v2598_v21 = vpop.f32.mrb[96].mxu1 }
 0x1b1   : > { %v2847_v33 = vadd.f32 %v2558_v30, %v2509_v6  ;;  %v2848_v47 = vadd.f32 %v2598_v21, %v2510_v7  ;;  %v4208_v34 = vpop.f32.mrb[97].mxu0  ;;  %v4214_v45 = vpop.f32.mrb[97].mxu1 }
 0x1b2   : > { %v2561_v54 = vpop.f32.mrb[98].mxu0  ;;  %v2601_v55 = vpop.f32.mrb[98].mxu1 }
 0x1b3   : > { %v4209_v60 = vpop.f32.mrb[99].mxu0  ;;  %v4215_v8 = vpop.f32.mrb[99].mxu1 }
 0x1b8   : > { %v2638_v56 = vpop.f32.mrb[100].mxu0  ;;  %v2678_v59 = vpop.f32.mrb[100].mxu1 }
 0x1b9   : > { %v2849_v48 = vadd.f32 %v2638_v56, %v2511_v11  ;;  %v2850_v49 = vadd.f32 %v2678_v59, %v2512_v18  ;;  %v4220_v61 = vpop.f32.mrb[101].mxu0  ;;  %v4226_v62 = vpop.f32.mrb[101].mxu1 }
 0x1ba   : > { %v2641_v63 = vpop.f32.mrb[102].mxu0  ;;  %v2681_v46 = vpop.f32.mrb[102].mxu1 }
 0x1bb   : > { %v4221_v0 = vpop.f32.mrb[103].mxu0  ;;  %v4227_v2 = vpop.f32.mrb[103].mxu1  ;;  %v3765_v46 = vld [vmem:[%s5180_s2] ss:$0 sm:$0xff] }
 0x1c0   : > { %v2718_v29 = vpop.f32.mrb[104].mxu0  ;;  %v2758_v9 = vpop.f32.mrb[104].mxu1 }
 0x1c1   : > { %v2851_v3 = vadd.f32 %v2718_v29, %v2513_v31  ;;  %v2852_v24 = vadd.f32 %v2758_v9, %v2514_v57  ;;  %v4232_v4 = vpop.f32.mrb[105].mxu0  ;;  %v4238_v5 = vpop.f32.mrb[105].mxu1 }
 0x1c2   : > { %v2721_v6 = vpop.f32.mrb[106].mxu0  ;;  %v2761_v7 = vpop.f32.mrb[106].mxu1 }
 0x1c3   : > { %v4233_v12 = vpop.f32.mrb[107].mxu0  ;;  %v4239_v52 = vpop.f32.mrb[107].mxu1 }
 0x1c8   : > { %v2798_v10 = vpop.f32.mrb[108].mxu0  ;;  %v2841_v53 = vpop.f32.mrb[108].mxu1 }
 0x1c9   : > { %v2853_v13 = vadd.f32 %v2798_v10, %v2515_v41  ;;  %v2854_v16 = vadd.f32 %v2841_v53, %v2516_v40  ;;  %v4244_v17 = vpop.f32.mrb[109].mxu0  ;;  %v4250_v25 = vpop.f32.mrb[109].mxu1 }
 0x1ca   : > { %v2801_v11 = vpop.f32.mrb[110].mxu0  ;;  %v2844_v18 = vpop.f32.mrb[110].mxu1 }
 0x1cb   : > { %v4245_v39 = vpop.f32.mrb[111].mxu0  ;;  %v4251_v14 = vpop.f32.mrb[111].mxu1 }
 0x1d0   : > { %v2896_v19 = vpop.f32.mrb[112].mxu0  ;;  %v2936_v22 = vpop.f32.mrb[112].mxu1 }
 0x1d1   : > { %v3185_v23 = vadd.f32 %v2896_v19, %v2847_v33  ;;  %v3186_v1 = vadd.f32 %v2936_v22, %v2848_v47  ;;  %v4256_v27 = vpop.f32.mrb[113].mxu0  ;;  %v4262_v28 = vpop.f32.mrb[113].mxu1 }
 0x1d2   : > { %v2899_v31 = vpop.f32.mrb[114].mxu0  ;;  %v2939_v57 = vpop.f32.mrb[114].mxu1 }
 0x1d3   : > { %v4257_v58 = vpop.f32.mrb[115].mxu0  ;;  %v4263_v15 = vpop.f32.mrb[115].mxu1 }
 0x1d8   : > { %v2976_v20 = vpop.f32.mrb[116].mxu0  ;;  %v3016_v32 = vpop.f32.mrb[116].mxu1 }
 0x1d9   : > { %v3187_v35 = vadd.f32 %v2976_v20, %v2849_v48  ;;  %v3188_v36 = vadd.f32 %v3016_v32, %v2850_v49  ;;  %v4268_v37 = vpop.f32.mrb[117].mxu0  ;;  %v4274_v38 = vpop.f32.mrb[117].mxu1 }
 0x1da   : > { %v2979_v41 = vpop.f32.mrb[118].mxu0  ;;  %v3019_v40 = vpop.f32.mrb[118].mxu1 }
 0x1db   : > { %v4269_v42 = vpop.f32.mrb[119].mxu0  ;;  %v4275_v43 = vpop.f32.mrb[119].mxu1 }
 0x1e0   : > { %v3056_v44 = vpop.f32.mrb[120].mxu0  ;;  %v3096_v50 = vpop.f32.mrb[120].mxu1 }
 0x1e1   : > { %v3189_v26 = vadd.f32 %v3056_v44, %v2851_v3  ;;  %v3190_v51 = vadd.f32 %v3096_v50, %v2852_v24  ;;  %v4280_v30 = vpop.f32.mrb[121].mxu0  ;;  %v4286_v21 = vpop.f32.mrb[121].mxu1 }
 0x1e2   : > { %v3059_v33 = vpop.f32.mrb[122].mxu0  ;;  %v3099_v47 = vpop.f32.mrb[122].mxu1 }
 0x1e3   : > { %v4281_v34 = vpop.f32.mrb[123].mxu0  ;;  %v4287_v45 = vpop.f32.mrb[123].mxu1 }
 0x1e8   : > { %v3136_v54 = vpop.f32.mrb[124].mxu0  ;;  %v3179_v55 = vpop.f32.mrb[124].mxu1 }
 0x1e9   : > { %v5096_v60 = vadd.f32 %v3136_v54, %v2853_v13  ;;  %v5098_v8 = vadd.f32 %v3179_v55, %v2854_v16  ;;  %v4292_v56 = vpop.f32.mrb[125].mxu0  ;;  %v4298_v59 = vpop.f32.mrb[125].mxu1 }
 0x1ea   : > { %v3139_v48 = vpop.f32.mrb[126].mxu0  ;;  %v3182_v49 = vpop.f32.mrb[126].mxu1 }
 0x1eb   : > { %v4293_v61 = vpop.f32.mrb[127].mxu0  ;;  %v4299_v62 = vpop.f32.mrb[127].mxu1 }
 0x1f0   : > { %v3234_v63 = vpop.f32.mrb[128].mxu0  ;;  %v3274_v0 = vpop.f32.mrb[128].mxu1 }
 0x1f1   : > { %v3530_v2 = vadd.f32 %v3234_v63, %v3185_v23  ;;  %v3531_v29 = vadd.f32 %v3274_v0, %v3186_v1  ;;  %v4304_v9 = vpop.f32.mrb[129].mxu0  ;;  %v4310_v3 = vpop.f32.mrb[129].mxu1 }
 0x1f2   : > { %v3237_v24 = vpop.f32.mrb[130].mxu0  ;;  %v3277_v4 = vpop.f32.mrb[130].mxu1 }
 0x1f3   : > { %v3545_v5 = vadd.f32 %v3765_v46, %v3530_v2  ;;  %v3546_v6 = vadd.f32 %v3765_v46, %v3531_v29  ;;  %v4305_v7 = vpop.f32.mrb[131].mxu0  ;;  %v4311_v12 = vpop.f32.mrb[131].mxu1 }
 0x1f5   : > { %v3553_v52 = vmax.f32 %v3545_v5, 0.0  ;;  %v3554_v10 = vmax.f32 %v3546_v6, 0.0 }
 0x1f7   : > { %3562 = vst.msk [vmem:[%s5106_s6] sm:$0xff] %vm3561_vm3, %v3553_v52  ;;  %3563 = vst.msk [vmem:[%s5106_s6 + $0x8] sm:$0xff] %vm3561_vm3, %v3554_v10 }
 0x1f8   : > { %v3314_v53 = vpop.f32.mrb[132].mxu0  ;;  %v3354_v13 = vpop.f32.mrb[132].mxu1 }
 0x1f9   : > { %v3532_v16 = vadd.f32 %v3314_v53, %v3187_v35  ;;  %v3533_v17 = vadd.f32 %v3354_v13, %v3188_v36  ;;  %v4316_v25 = vpop.f32.mrb[133].mxu0  ;;  %v4322_v11 = vpop.f32.mrb[133].mxu1 }
 0x1fa   : > { %v3317_v18 = vpop.f32.mrb[134].mxu0  ;;  %v3357_v39 = vpop.f32.mrb[134].mxu1 }
 0x1fb   : > { %v3547_v14 = vadd.f32 %v3765_v46, %v3532_v16  ;;  %v3548_v19 = vadd.f32 %v3765_v46, %v3533_v17  ;;  %v4317_v22 = vpop.f32.mrb[135].mxu0  ;;  %v4323_v23 = vpop.f32.mrb[135].mxu1 }
 0x1fd   : > { %v3555_v1 = vmax.f32 %v3547_v14, 0.0  ;;  %v3556_v27 = vmax.f32 %v3548_v19, 0.0 }
 0x1ff   : > { %3564 = vst.msk [vmem:[%s5106_s6 + $0x10] sm:$0xff] %vm3561_vm3, %v3555_v1  ;;  %3565 = vst.msk [vmem:[%s5106_s6 + $0x18] sm:$0xff] %vm3561_vm3, %v3556_v27 }
 0x200   : > { %v3394_v28 = vpop.f32.mrb[136].mxu0  ;;  %v3434_v31 = vpop.f32.mrb[136].mxu1 }
 0x201   : > { %v3534_v57 = vadd.f32 %v3394_v28, %v3189_v26  ;;  %v3535_v58 = vadd.f32 %v3434_v31, %v3190_v51  ;;  %v4328_v15 = vpop.f32.mrb[137].mxu0  ;;  %v4334_v20 = vpop.f32.mrb[137].mxu1 }
 0x202   : > { %v3397_v32 = vpop.f32.mrb[138].mxu0  ;;  %v3437_v35 = vpop.f32.mrb[138].mxu1 }
 0x203   : > { %v3549_v36 = vadd.f32 %v3765_v46, %v3534_v57  ;;  %v3550_v37 = vadd.f32 %v3765_v46, %v3535_v58  ;;  %v4329_v38 = vpop.f32.mrb[139].mxu0  ;;  %v4335_v41 = vpop.f32.mrb[139].mxu1 }
 0x205   : > { %v3557_v40 = vmax.f32 %v3549_v36, 0.0  ;;  %v3558_v42 = vmax.f32 %v3550_v37, 0.0 }
 0x207   : > { %3566 = vst.msk [vmem:[%s5106_s6 + $0x20] sm:$0xff] %vm3561_vm3, %v3557_v40  ;;  %3567 = vst.msk [vmem:[%s5106_s6 + $0x28] sm:$0xff] %vm3561_vm3, %v3558_v42 }
 0x208   : > { %v3474_v43 = vpop.f32.mrb[140].mxu0  ;;  %v3524_v44 = vpop.f32.mrb[140].mxu1 }
 0x209   : > { %v3536_v50 = vadd.f32 %v3474_v43, %v5096_v60  ;;  %v3537_v26 = vadd.f32 %v3524_v44, %v5098_v8  ;;  %v4340_v51 = vpop.f32.mrb[141].mxu0  ;;  %v4346_v30 = vpop.f32.mrb[141].mxu1 }
 0x20a   : > { %v3477_v21 = vpop.f32.mrb[142].mxu0  ;;  %v3527_v33 = vpop.f32.mrb[142].mxu1 }
 0x20b   : > { %v3551_v47 = vadd.f32 %v3765_v46, %v3536_v50  ;;  %v3552_v34 = vadd.f32 %v3765_v46, %v3537_v26  ;;  %v4341_v45 = vpop.f32.mrb[143].mxu0  ;;  %v4347_v54 = vpop.f32.mrb[143].mxu1 }
 0x20d   : > { %v3559_v55 = vmax.f32 %v3551_v47, 0.0  ;;  %v3560_v60 = vmax.f32 %v3552_v34, 0.0 }
 0x20f   : > { %3568 = vst.msk [vmem:[%s5106_s6 + $0x30] sm:$0xff] %vm3561_vm3, %v3559_v55  ;;  %3569 = vst.msk [vmem:[%s5106_s6 + $0x38] sm:$0xff] %vm3561_vm3, %v3560_v60 }
 0x210   : > { %4405 = shalt.err (!%p4402_p3)
}
 0x211   : > { %s4406_s25 = scalar_lea.hbm %s5127_s11, 1024  ;;  %s4410_s28 = scalar_lea.hbm %s5181_s3, 2048 }
 0x212   : > { %p4407_p4 = scmp.ne.s32.totalorder %s5127_s11, %s4406_s25  ;;  %p4411_p9 = scmp.lt.u32.totalorder %s5127_s11, %s5181_s3 }
 0x213   : > { %p4412_p10 = scmp.lt.u32.totalorder %s4410_s28, %s4406_s25  ;;  %p4414_p12 = scmp.lt.u32.totalorder %s4406_s25, %s5127_s11 }
 0x214   : > { %p4408_p7 = pnand %p4407_p4, %p4519_p5 }
 0x215   : > { %p4413_p11 = por %p4412_p10, %p4411_p9 }
 0x216   : > { %p4409_p8 = pneg %p4408_p7 }
 0x217   : > { %p4415_p13 = por %p4414_p12, %p4413_p11 }
 0x219   : > { %p4416_p0 = pnand %p4415_p13, %p4409_p8 }
 0x21b   : > { %4419 = shalt.err (!%p4416_p0)
}
 0x21c   : > { %s4459_s4 = smov 128   ;;  %s4460_s5 = smov 8  }
 0x21d   : > { %4349 = dma.vmem_to_hbm [thread:$0]  (%p4519_p5), %s5129_s8, 1024, %s5127_s11, %s5137_s16, %s4459_s4, %s4459_s4, %s4460_s5  }
 0x21e PF: > { %p4355_p1 = scmp.ge.s32.totalorder %s4454_s15, 2  ;;  %s3599_s6 = sand.u32 1, %s4442_s12  }
 0x21f   : > { %s3600_s7 = scalar_lea.sflag [#allocation3], %s3599_s6 }
 0x220   : > { %p4352_p2 = pnand %p4355_p1, %p4523_p6 }
 0x222   : > { %4437 = dma.done.wait (!%p4352_p2), %s3600_s7, 1024  }
 0x223   : > { %4439 = vsyncadd (!%p4352_p2), %s3600_s7, 4294966272  ;;  %p13_p3 = scmp.ge.s32.totalorder %s4506_s18, 4   ;;  %s5184_s12 = smov %s4446_s13 }
 0x224   : > { %s5185_s13 = smov %s4450_s14  ;;  %s5186_s14 = smov %s4517_s21 }
 0x225   : > { %s5187_s15 = smov %s4506_s18  ;;  %15 = sbr.rel (!%p13_p3) target bundleno = 3 (0x3), region = 78 }
 0x22c   :  { %3605 = vsyncpa [#allocation3], 1 }
 0x22d   :  { %3607 = vsyncpa [#allocation3 + $0x1], 1 }

</bundles_post_ra>
